<compile_context>
chip_gen: v5e
topology: v5e:2x2
jax: 0.10.0
libtpu: 0.0.40
codegen_flags: <defaults>
</compile_context>

<pallas_src>
import functools

import jax
import jax.numpy as jnp
import numpy as np
from jax import lax
from jax.experimental import pallas as pl
from jax.experimental.pallas import tpu as pltpu


def _attention_core(Qp, Rp, Kp, Vp, out_ref, *, TB, S, A, num_heads, head_dim,
                    scale_att, relu_before_att):
    """Attention math on already-projected f32 [TB*S, A] activations."""
    if relu_before_att:
        Qp = jnp.maximum(Qp, 0.0)
        Kp = jnp.maximum(Kp, 0.0)
        Vp = jnp.maximum(Vp, 0.0)

    inv_sqrt_hd = 1.0 / float(head_dim) ** 0.5
    dn = (((1,), (1,)), ((), ()))   # contract last dims, no batch dims (no .T)

    for tb in range(TB):            # static: TB is small and trace-time known
        r0 = tb * S
        Qb = Qp[r0:r0 + S, :]       # [S, A]
        Kb = Kp[r0:r0 + S, :]
        Vb = Vp[r0:r0 + S, :]
        Rb = Rp[r0:r0 + S, :]

        mu_Q = jnp.mean(Qb, axis=0, keepdims=True)   # [1, A], all heads at once
        mu_K = jnp.mean(Kb, axis=0, keepdims=True)
        Qc = Qb - mu_Q
        Kc = Kb - mu_K
        if scale_att:
            # Only the pairwise logits are scaled; mu_Q (unary logits) must stay
            # unscaled, so 1/sqrt(hd) cannot be folded into the weights.
            Qc = Qc * inv_sqrt_hd

        # Unary logits for all heads at once: elementwise K * mu_Q (VPU);
        # the per-head reduction below is a lane-group sum (XLU), not a matmul.
        t = Kb * mu_Q                                 # [S, A]

        for h in range(num_heads):                    # static, small
            lo = h * head_dim
            hi = lo + head_dim

            # Pairwise attention [S, S]; softmax over the key axis.
            s = lax.dot_general(Qc[:, lo:hi], Kc[:, lo:hi], dn,
                                preferred_element_type=jnp.float32)
            s = s - jnp.max(s, axis=1, keepdims=True)
            p = jnp.exp(s)
            p = p * pl.reciprocal(jnp.sum(p, axis=1, keepdims=True), approx=True)

            # Unary attention over keys: softmax_k( sum_d K[k,d] * mu_Q[d] ).
            u = jnp.sum(t[:, lo:hi], axis=1, keepdims=True)            # [S, 1]
            u = u - jnp.max(u, axis=0, keepdims=True)
            e = jnp.exp(u)
            e = e * pl.reciprocal(jnp.sum(e, axis=0, keepdims=True), approx=True)

            # (pairwise + unary) @ V_h == pairwise @ V_h + 1·(u^T V_h); the
            # unary term is identical for every query row, so it reduces to a
            # VPU multiply + sublane sum instead of an M=1 matmul + transpose.
            uv = jnp.sum(e * Vb[:, lo:hi], axis=0, keepdims=True)      # [1, hd]
            oh = jnp.dot(p, Vb[:, lo:hi],
                         preferred_element_type=jnp.float32) + uv      # [S, hd]

            # Write straight into the output block at the head's column offset:
            # the out VMEM block is the accumulator (no head list, no concat).
            out_ref[r0:r0 + S, lo:hi] = (oh + Rb[:, lo:hi]).astype(out_ref.dtype)


def _kernel_distinct(q_ref, k_ref, v_ref, w_ref, b_ref, out_ref, *,
                     block_batch, seq_len, atten_dim, num_heads, head_dim,
                     scale_att, relu_before_att):
    """Distinct q/k/v arrays: fused [wq|wr] (N=2A) projection + wk + wv."""
    A = atten_dim
    q2 = q_ref[...]                 # [TB*S, E] (bf16)
    k2 = k_ref[...]
    v2 = v_ref[...]

    QR = jnp.dot(q2, w_ref[:, :2 * A],
                 preferred_element_type=jnp.float32) + b_ref[:, :2 * A]
    Kp = jnp.dot(k2, w_ref[:, 2 * A:3 * A],
                 preferred_element_type=jnp.float32) + b_ref[:, 2 * A:3 * A]
    Vp = jnp.dot(v2, w_ref[:, 3 * A:],
                 preferred_element_type=jnp.float32) + b_ref[:, 3 * A:]

    _attention_core(QR[:, :A], QR[:, A:], Kp, Vp, out_ref,
                    TB=block_batch, S=seq_len, A=A, num_heads=num_heads,
                    head_dim=head_dim, scale_att=scale_att,
                    relu_before_att=relu_before_att)


def _kernel_shared(x_ref, w_ref, b_ref, out_ref, *, block_batch, seq_len,
                   atten_dim, num_heads, head_dim, scale_att, relu_before_att):
    """query is key is value: one fused N=4A(=256) projection matmul."""
    A = atten_dim
    x2 = x_ref[...]                 # [TB*S, E] (bf16)
    P = jnp.dot(x2, w_ref[...], preferred_element_type=jnp.float32) + b_ref[...]

    _attention_core(P[:, :A], P[:, A:2 * A], P[:, 2 * A:3 * A], P[:, 3 * A:],
                    out_ref, TB=block_batch, S=seq_len, A=A,
                    num_heads=num_heads, head_dim=head_dim,
                    scale_att=scale_att, relu_before_att=relu_before_att)


def _pick_block_batch(batch, max_block=8):
    """Largest divisor of `batch` (<= max_block) that keeps >=2 grid steps
    so both v7x TensorCores get work; falls back to 1."""
    best = 1
    for tb in range(1, min(batch, max_block) + 1):
        if batch % tb == 0 and batch // tb >= 2:
            best = tb
    return best


def disentangled_attention(query, key, value, params, *, num_heads,
                           scale_att=False, relu_before_att=False,
                           block_batch=None, mxu_dtype=jnp.bfloat16):
    B, S, E = query.shape
    A = params["wq"].shape[1]
    head_dim = A // num_heads

    TB = _pick_block_batch(B) if block_batch is None else block_batch
    if B % TB != 0:
        raise ValueError(f"block_batch={TB} must divide batch={B}")

    # One packed weight slab [E, 4A] = [wq | wr | wk | wv] (bf16 for the MXU)
    # and one packed f32 bias slab [1, 4A].
    w_all = jnp.concatenate(
        [params["wq"], params["wr"], params["wk"], params["wv"]],
        axis=1).astype(mxu_dtype)
    b_all = jnp.concatenate(
        [params["bq"], params["br"], params["bk"], params["bv"]]
    ).reshape(1, 4 * A).astype(jnp.float32)

    statics = dict(block_batch=TB, seq_len=S, atten_dim=A,
                   num_heads=num_heads, head_dim=head_dim,
                   scale_att=scale_att, relu_before_att=relu_before_att)

    # Sequence tensors and output presented flat as [B*S, .] (free wrapper-side
    # reshapes of contiguous arrays) so no in-kernel reshapes are needed.
    seq_spec = pl.BlockSpec((TB * S, E), lambda i: (i, 0))
    w_spec = pl.BlockSpec((E, 4 * A), lambda i: (0, 0))
    b_spec = pl.BlockSpec((1, 4 * A), lambda i: (0, 0))
    out_spec = pl.BlockSpec((TB * S, A), lambda i: (i, 0))
    cparams = pltpu.CompilerParams(dimension_semantics=("parallel",))
    out_shape = jax.ShapeDtypeStruct((B * S, A), jnp.float32)
    grid = (B // TB,)

    shared = (query is key) and (query is value)
    if shared:
        out = pl.pallas_call(
            functools.partial(_kernel_shared, **statics),
            out_shape=out_shape, grid=grid,
            in_specs=[seq_spec, w_spec, b_spec], out_specs=out_spec,
            compiler_params=cparams,
        )(query.reshape(B * S, E).astype(mxu_dtype), w_all, b_all)
    else:
        out = pl.pallas_call(
            functools.partial(_kernel_distinct, **statics),
            out_shape=out_shape, grid=grid,
            in_specs=[seq_spec, seq_spec, seq_spec, w_spec, b_spec],
            out_specs=out_spec, compiler_params=cparams,
        )(query.reshape(B * S, E).astype(mxu_dtype),
          key.reshape(B * S, E).astype(mxu_dtype),
          value.reshape(B * S, E).astype(mxu_dtype),
          w_all, b_all)
    return out.reshape(B, S, A)


def reference(query, key, value, params, *, num_heads,
              scale_att=False, relu_before_att=False):
    """Pure-JAX (f32) transcription of the PyTorch forward pass."""
    Q = query @ params["wq"] + params["bq"]
    K = key @ params["wk"] + params["bk"]
    V = value @ params["wv"] + params["bv"]
    if relu_before_att:
        Q, K, V = jax.nn.relu(Q), jax.nn.relu(K), jax.nn.relu(V)

    def to_hb(x):  # split heads along dim 2, cat along dim 0 (head-major)
        return jnp.concatenate(jnp.split(x, num_heads, axis=2), axis=0)

    Q_, K_, V_ = to_hb(Q), to_hb(K), to_hb(V)
    mu_Q = Q_.mean(axis=1, keepdims=True)
    mu_K = K_.mean(axis=1, keepdims=True)
    Qc = Q_ - mu_Q
    Kc = K_ - mu_K
    pairwise = jnp.einsum("bqd,bkd->bqk", Qc, Kc)
    if scale_att:
        pairwise = pairwise / (K_.shape[-1] ** 0.5)
    pairwise = jax.nn.softmax(pairwise, axis=2)
    unary = jnp.einsum("bkd,bqd->bkq", K_, mu_Q)          # uncentered K
    unary = jax.nn.softmax(unary, axis=1)
    unary = jnp.transpose(unary, (0, 2, 1))               # [HB, 1, S]
    out = jnp.einsum("bqk,bkd->bqd", pairwise + unary, V_)
    out = jnp.concatenate(jnp.split(out, num_heads, axis=0), axis=2)
    out = out + (query @ params["wr"] + params["br"])
    return out


def make_params(key, embed_dim, atten_dim):
    ks = jax.random.split(key, 8)
    scale = 0.1
    return {
        "wq": scale * jax.random.normal(ks[0], (embed_dim, atten_dim), jnp.float32),
        "bq": scale * jax.random.normal(ks[1], (atten_dim,), jnp.float32),
        "wk": scale * jax.random.normal(ks[2], (embed_dim, atten_dim), jnp.float32),
        "bk": scale * jax.random.normal(ks[3], (atten_dim,), jnp.float32),
        "wv": scale * jax.random.normal(ks[4], (embed_dim, atten_dim), jnp.float32),
        "bv": scale * jax.random.normal(ks[5], (atten_dim,), jnp.float32),
        "wr": scale * jax.random.normal(ks[6], (embed_dim, atten_dim), jnp.float32),
        "br": scale * jax.random.normal(ks[7], (atten_dim,), jnp.float32),
    }


if __name__ == "__main__":
    # Module defaults: embed_dim=16, atten_dim=64, num_heads=2, dropout=0,
    # residual=True, scale_att=False, relu_before_att=False.
    EMBED_DIM, ATTEN_DIM, NUM_HEADS, S = 16, 64, 2, 8
    root = jax.random.PRNGKey(0)
    kp, kq, kk, kv, kx = jax.random.split(root, 5)
    params = make_params(kp, EMBED_DIM, ATTEN_DIM)

    # Tolerance loosened vs the f32 reference because the kernel uses bf16 MXU
    # operands for the projections and EUP approximate reciprocals (softmax).
    TOL = dict(rtol=3e-2, atol=3e-2)

    # 1) Module defaults, distinct q/k/v; B=8 -> TB=4 (grid=(2,), 32-row
    #    projection matmuls per step).
    B = 8
    q = jax.random.normal(kq, (B, S, EMBED_DIM), jnp.float32)
    k = jax.random.normal(kk, (B, S, EMBED_DIM), jnp.float32)
    v = jax.random.normal(kv, (B, S, EMBED_DIM), jnp.float32)
    out = jax.block_until_ready(
        disentangled_attention(q, k, v, params, num_heads=NUM_HEADS))
    ref = reference(q, k, v, params, num_heads=NUM_HEADS)
    np.testing.assert_allclose(np.asarray(out), np.asarray(ref), **TOL)

    # 2) scale_att + relu_before_att branches; B=2 -> TB=1 (grid=(2,)).
    out2 = jax.block_until_ready(
        disentangled_attention(q[:2], k[:2], v[:2], params,
                               num_heads=NUM_HEADS,
                               scale_att=True, relu_before_att=True))
    ref2 = reference(q[:2], k[:2], v[:2], params, num_heads=NUM_HEADS,
                     scale_att=True, relu_before_att=True)
    np.testing.assert_allclose(np.asarray(out2), np.asarray(ref2), **TOL)

    # 3) Shared-input self-attention path (single N=256 projection matmul);
    #    B=4 -> TB=2 (grid=(2,)).
    x = jax.random.normal(kx, (4, S, EMBED_DIM), jnp.float32)
    out3 = jax.block_until_ready(
        disentangled_attention(x, x, x, params, num_heads=NUM_HEADS))
    ref3 = reference(x, x, x, params, num_heads=NUM_HEADS)
    np.testing.assert_allclose(np.asarray(out3), np.asarray(ref3), **TOL)

    print("KERNEL_OK")
</pallas_src>

<mosaic_0001>
module attributes {stable_mosaic.version = 11 : i64} {
  func.func @_kernel_distinct(%arg0: i32, %arg1: memref<32x16xbf16, #tpu.memory_space<vmem>>, %arg2: memref<32x16xbf16, #tpu.memory_space<vmem>>, %arg3: memref<32x16xbf16, #tpu.memory_space<vmem>>, %arg4: memref<16x256xbf16, #tpu.memory_space<vmem>>, %arg5: memref<1x256xf32, #tpu.memory_space<vmem>>, %arg6: memref<32x64xf32, #tpu.memory_space<vmem>>) attributes {dimension_semantics = [#tpu.dimension_semantics<parallel>], iteration_bounds = array<i64: 2>, scalar_prefetch = 0 : i64, scratch_operands = 0 : i64, tpu.core_type = #tpu.core_type<tc>, window_params = [{transform_indices = @transform_0, window_bounds = array<i64: 32, 16>}, {transform_indices = @transform_1, window_bounds = array<i64: 32, 16>}, {transform_indices = @transform_2, window_bounds = array<i64: 32, 16>}, {pipeline_mode = #tpu.pipeline_mode<synchronous>, transform_indices = @transform_3, window_bounds = array<i64: 16, 256>}, {pipeline_mode = #tpu.pipeline_mode<synchronous>, transform_indices = @transform_4, window_bounds = array<i64: 1, 256>}, {transform_indices = @transform_5, window_bounds = array<i64: 32, 64>}]} {
    %c0 = arith.constant 0 : index
    %c0_0 = arith.constant 0 : index
    %0 = vector.load %arg1[%c0, %c0_0] : memref<32x16xbf16, #tpu.memory_space<vmem>>, vector<32x16xbf16>
    %c0_1 = arith.constant 0 : index
    %c0_2 = arith.constant 0 : index
    %1 = vector.load %arg2[%c0_1, %c0_2] : memref<32x16xbf16, #tpu.memory_space<vmem>>, vector<32x16xbf16>
    %c0_3 = arith.constant 0 : index
    %c0_4 = arith.constant 0 : index
    %2 = vector.load %arg3[%c0_3, %c0_4] : memref<32x16xbf16, #tpu.memory_space<vmem>>, vector<32x16xbf16>
    %c0_5 = arith.constant 0 : index
    %c0_6 = arith.constant 0 : index
    %3 = vector.load %arg4[%c0_5, %c0_6] : memref<16x256xbf16, #tpu.memory_space<vmem>>, vector<16x128xbf16>
    %cst = arith.constant dense<0.000000e+00> : vector<32x128xf32>
    %4 = tpu.matmul %0, %3, %cst {dimension_numbers = #tpu.dot_dimension_numbers<[1], [0], [0], [1], [0, 0, 1, 1], [], []>} : vector<32x16xbf16>, vector<16x128xbf16>, vector<32x128xf32> -> vector<32x128xf32>
    %c0_7 = arith.constant 0 : index
    %c0_8 = arith.constant 0 : index
    %5 = vector.load %arg5[%c0_7, %c0_8] : memref<1x256xf32, #tpu.memory_space<vmem>>, vector<1x128xf32>
    %6 = vector.broadcast %5 : vector<1x128xf32> to vector<32x128xf32>
    %7 = arith.addf %4, %6 : vector<32x128xf32>
    %c0_9 = arith.constant 0 : index
    %c128 = arith.constant 128 : index
    %8 = vector.load %arg4[%c0_9, %c128] : memref<16x256xbf16, #tpu.memory_space<vmem>>, vector<16x64xbf16>
    %cst_10 = arith.constant dense<0.000000e+00> : vector<32x64xf32>
    %9 = tpu.matmul %1, %8, %cst_10 {dimension_numbers = #tpu.dot_dimension_numbers<[1], [0], [0], [1], [0, 0, 1, 1], [], []>} : vector<32x16xbf16>, vector<16x64xbf16>, vector<32x64xf32> -> vector<32x64xf32>
    %c0_11 = arith.constant 0 : index
    %c128_12 = arith.constant 128 : index
    %10 = vector.load %arg5[%c0_11, %c128_12] : memref<1x256xf32, #tpu.memory_space<vmem>>, vector<1x64xf32>
    %11 = vector.broadcast %10 : vector<1x64xf32> to vector<32x64xf32>
    %12 = arith.addf %9, %11 : vector<32x64xf32>
    %c0_13 = arith.constant 0 : index
    %c192 = arith.constant 192 : index
    %13 = vector.load %arg4[%c0_13, %c192] : memref<16x256xbf16, #tpu.memory_space<vmem>>, vector<16x64xbf16>
    %cst_14 = arith.constant dense<0.000000e+00> : vector<32x64xf32>
    %14 = tpu.matmul %2, %13, %cst_14 {dimension_numbers = #tpu.dot_dimension_numbers<[1], [0], [0], [1], [0, 0, 1, 1], [], []>} : vector<32x16xbf16>, vector<16x64xbf16>, vector<32x64xf32> -> vector<32x64xf32>
    %c0_15 = arith.constant 0 : index
    %c192_16 = arith.constant 192 : index
    %15 = vector.load %arg5[%c0_15, %c192_16] : memref<1x256xf32, #tpu.memory_space<vmem>>, vector<1x64xf32>
    %16 = vector.broadcast %15 : vector<1x64xf32> to vector<32x64xf32>
    %17 = arith.addf %14, %16 : vector<32x64xf32>
    %18 = vector.extract_strided_slice %7 {offsets = [0, 0], sizes = [32, 64], strides = [1, 1]} : vector<32x128xf32> to vector<32x64xf32>
    %19 = vector.extract_strided_slice %7 {offsets = [0, 64], sizes = [32, 64], strides = [1, 1]} : vector<32x128xf32> to vector<32x64xf32>
    %20 = vector.extract_strided_slice %18 {offsets = [0, 0], sizes = [8, 64], strides = [1, 1]} : vector<32x64xf32> to vector<8x64xf32>
    %21 = vector.extract_strided_slice %12 {offsets = [0, 0], sizes = [8, 64], strides = [1, 1]} : vector<32x64xf32> to vector<8x64xf32>
    %22 = vector.extract_strided_slice %17 {offsets = [0, 0], sizes = [8, 64], strides = [1, 1]} : vector<32x64xf32> to vector<8x64xf32>
    %23 = vector.extract_strided_slice %19 {offsets = [0, 0], sizes = [8, 64], strides = [1, 1]} : vector<32x64xf32> to vector<8x64xf32>
    %cst_17 = arith.constant dense<0.000000e+00> : vector<64xf32>
    %24 = vector.multi_reduction <add>, %20, %cst_17 [0] : vector<8x64xf32> to vector<64xf32>
    %25 = vector.shape_cast %24 : vector<64xf32> to vector<1x64xf32>
    %cst_18 = arith.constant 8.000000e+00 : f32
    %26 = vector.broadcast %cst_18 : f32 to vector<1x64xf32>
    %27 = arith.divf %25, %26 : vector<1x64xf32>
    %cst_19 = arith.constant dense<0.000000e+00> : vector<64xf32>
    %28 = vector.multi_reduction <add>, %21, %cst_19 [0] : vector<8x64xf32> to vector<64xf32>
    %29 = vector.shape_cast %28 : vector<64xf32> to vector<1x64xf32>
    %cst_20 = arith.constant 8.000000e+00 : f32
    %30 = vector.broadcast %cst_20 : f32 to vector<1x64xf32>
    %31 = arith.divf %29, %30 : vector<1x64xf32>
    %32 = vector.broadcast %27 : vector<1x64xf32> to vector<8x64xf32>
    %33 = arith.subf %20, %32 : vector<8x64xf32>
    %34 = vector.broadcast %31 : vector<1x64xf32> to vector<8x64xf32>
    %35 = arith.subf %21, %34 : vector<8x64xf32>
    %36 = vector.broadcast %27 : vector<1x64xf32> to vector<8x64xf32>
    %37 = arith.mulf %21, %36 : vector<8x64xf32>
    %38 = vector.extract_strided_slice %33 {offsets = [0, 0], sizes = [8, 32], strides = [1, 1]} : vector<8x64xf32> to vector<8x32xf32>
    %39 = vector.extract_strided_slice %35 {offsets = [0, 0], sizes = [8, 32], strides = [1, 1]} : vector<8x64xf32> to vector<8x32xf32>
    %cst_21 = arith.constant dense<0.000000e+00> : vector<8x8xf32>
    %40 = tpu.matmul %38, %39, %cst_21 {dimension_numbers = #tpu.dot_dimension_numbers<[1], [1], [0], [0], [0, 0, 1, 0], [], []>} : vector<8x32xf32>, vector<8x32xf32>, vector<8x8xf32> -> vector<8x8xf32>
    %cst_22 = arith.constant dense<0xFF800000> : vector<8xf32>
    %41 = vector.multi_reduction <maximumf>, %40, %cst_22 [1] : vector<8x8xf32> to vector<8xf32>
    %42 = vector.shape_cast %41 : vector<8xf32> to vector<8x1xf32>
    %43 = vector.broadcast %42 : vector<8x1xf32> to vector<8x8xf32>
    %44 = arith.subf %40, %43 : vector<8x8xf32>
    %45 = math.exp %44 : vector<8x8xf32>
    %cst_23 = arith.constant dense<0.000000e+00> : vector<8xf32>
    %46 = vector.multi_reduction <add>, %45, %cst_23 [1] : vector<8x8xf32> to vector<8xf32>
    %47 = vector.shape_cast %46 : vector<8xf32> to vector<8x1xf32>
    %48 = tpu.reciprocal %47 {approx = true} : vector<8x1xf32> -> vector<8x1xf32>
    %49 = vector.broadcast %48 : vector<8x1xf32> to vector<8x8xf32>
    %50 = arith.mulf %45, %49 : vector<8x8xf32>
    %51 = vector.extract_strided_slice %37 {offsets = [0, 0], sizes = [8, 32], strides = [1, 1]} : vector<8x64xf32> to vector<8x32xf32>
    %cst_24 = arith.constant dense<0.000000e+00> : vector<8xf32>
    %52 = vector.multi_reduction <add>, %51, %cst_24 [1] : vector<8x32xf32> to vector<8xf32>
    %53 = vector.shape_cast %52 : vector<8xf32> to vector<8x1xf32>
    %cst_25 = arith.constant dense<0xFF800000> : vector<1xf32>
    %54 = vector.multi_reduction <maximumf>, %53, %cst_25 [0] : vector<8x1xf32> to vector<1xf32>
    %55 = vector.shape_cast %54 : vector<1xf32> to vector<1x1xf32>
    %56 = vector.broadcast %55 : vector<1x1xf32> to vector<8x1xf32>
    %57 = arith.subf %53, %56 : vector<8x1xf32>
    %58 = math.exp %57 : vector<8x1xf32>
    %cst_26 = arith.constant dense<0.000000e+00> : vector<1xf32>
    %59 = vector.multi_reduction <add>, %58, %cst_26 [0] : vector<8x1xf32> to vector<1xf32>
    %60 = vector.shape_cast %59 : vector<1xf32> to vector<1x1xf32>
    %61 = tpu.reciprocal %60 {approx = true} : vector<1x1xf32> -> vector<1x1xf32>
    %62 = vector.broadcast %61 : vector<1x1xf32> to vector<8x1xf32>
    %63 = arith.mulf %58, %62 : vector<8x1xf32>
    %64 = vector.extract_strided_slice %22 {offsets = [0, 0], sizes = [8, 32], strides = [1, 1]} : vector<8x64xf32> to vector<8x32xf32>
    %65 = vector.broadcast %63 : vector<8x1xf32> to vector<8x32xf32>
    %66 = arith.mulf %65, %64 : vector<8x32xf32>
    %cst_27 = arith.constant dense<0.000000e+00> : vector<32xf32>
    %67 = vector.multi_reduction <add>, %66, %cst_27 [0] : vector<8x32xf32> to vector<32xf32>
    %68 = vector.shape_cast %67 : vector<32xf32> to vector<1x32xf32>
    %69 = vector.extract_strided_slice %22 {offsets = [0, 0], sizes = [8, 32], strides = [1, 1]} : vector<8x64xf32> to vector<8x32xf32>
    %cst_28 = arith.constant dense<0.000000e+00> : vector<8x32xf32>
    %70 = tpu.matmul %50, %69, %cst_28 {dimension_numbers = #tpu.dot_dimension_numbers<[1], [0], [0], [1], [0, 0, 1, 1], [], []>} : vector<8x8xf32>, vector<8x32xf32>, vector<8x32xf32> -> vector<8x32xf32>
    %71 = vector.broadcast %68 : vector<1x32xf32> to vector<8x32xf32>
    %72 = arith.addf %70, %71 : vector<8x32xf32>
    %73 = vector.extract_strided_slice %23 {offsets = [0, 0], sizes = [8, 32], strides = [1, 1]} : vector<8x64xf32> to vector<8x32xf32>
    %74 = arith.addf %72, %73 : vector<8x32xf32>
    %c0_29 = arith.constant 0 : index
    %c0_30 = arith.constant 0 : index
    %75 = vector.load %arg6[%c0_29, %c0_30] : memref<32x64xf32, #tpu.memory_space<vmem>>, vector<8x32xf32>
    tpu.vector_store %arg6[%c0_29, %c0_30], %74 {strides = array<i32>} : memref<32x64xf32, #tpu.memory_space<vmem>>, vector<8x32xf32>,
    %76 = vector.extract_strided_slice %33 {offsets = [0, 32], sizes = [8, 32], strides = [1, 1]} : vector<8x64xf32> to vector<8x32xf32>
    %77 = vector.extract_strided_slice %35 {offsets = [0, 32], sizes = [8, 32], strides = [1, 1]} : vector<8x64xf32> to vector<8x32xf32>
    %cst_31 = arith.constant dense<0.000000e+00> : vector<8x8xf32>
    %78 = tpu.matmul %76, %77, %cst_31 {dimension_numbers = #tpu.dot_dimension_numbers<[1], [1], [0], [0], [0, 0, 1, 0], [], []>} : vector<8x32xf32>, vector<8x32xf32>, vector<8x8xf32> -> vector<8x8xf32>
    %cst_32 = arith.constant dense<0xFF800000> : vector<8xf32>
    %79 = vector.multi_reduction <maximumf>, %78, %cst_32 [1] : vector<8x8xf32> to vector<8xf32>
    %80 = vector.shape_cast %79 : vector<8xf32> to vector<8x1xf32>
    %81 = vector.broadcast %80 : vector<8x1xf32> to vector<8x8xf32>
    %82 = arith.subf %78, %81 : vector<8x8xf32>
    %83 = math.exp %82 : vector<8x8xf32>
    %cst_33 = arith.constant dense<0.000000e+00> : vector<8xf32>
    %84 = vector.multi_reduction <add>, %83, %cst_33 [1] : vector<8x8xf32> to vector<8xf32>
    %85 = vector.shape_cast %84 : vector<8xf32> to vector<8x1xf32>
    %86 = tpu.reciprocal %85 {approx = true} : vector<8x1xf32> -> vector<8x1xf32>
    %87 = vector.broadcast %86 : vector<8x1xf32> to vector<8x8xf32>
    %88 = arith.mulf %83, %87 : vector<8x8xf32>
    %89 = vector.extract_strided_slice %37 {offsets = [0, 32], sizes = [8, 32], strides = [1, 1]} : vector<8x64xf32> to vector<8x32xf32>
    %cst_34 = arith.constant dense<0.000000e+00> : vector<8xf32>
    %90 = vector.multi_reduction <add>, %89, %cst_34 [1] : vector<8x32xf32> to vector<8xf32>
    %91 = vector.shape_cast %90 : vector<8xf32> to vector<8x1xf32>
    %cst_35 = arith.constant dense<0xFF800000> : vector<1xf32>
    %92 = vector.multi_reduction <maximumf>, %91, %cst_35 [0] : vector<8x1xf32> to vector<1xf32>
    %93 = vector.shape_cast %92 : vector<1xf32> to vector<1x1xf32>
    %94 = vector.broadcast %93 : vector<1x1xf32> to vector<8x1xf32>
    %95 = arith.subf %91, %94 : vector<8x1xf32>
    %96 = math.exp %95 : vector<8x1xf32>
    %cst_36 = arith.constant dense<0.000000e+00> : vector<1xf32>
    %97 = vector.multi_reduction <add>, %96, %cst_36 [0] : vector<8x1xf32> to vector<1xf32>
    %98 = vector.shape_cast %97 : vector<1xf32> to vector<1x1xf32>
    %99 = tpu.reciprocal %98 {approx = true} : vector<1x1xf32> -> vector<1x1xf32>
    %100 = vector.broadcast %99 : vector<1x1xf32> to vector<8x1xf32>
    %101 = arith.mulf %96, %100 : vector<8x1xf32>
    %102 = vector.extract_strided_slice %22 {offsets = [0, 32], sizes = [8, 32], strides = [1, 1]} : vector<8x64xf32> to vector<8x32xf32>
    %103 = vector.broadcast %101 : vector<8x1xf32> to vector<8x32xf32>
    %104 = arith.mulf %103, %102 : vector<8x32xf32>
    %cst_37 = arith.constant dense<0.000000e+00> : vector<32xf32>
    %105 = vector.multi_reduction <add>, %104, %cst_37 [0] : vector<8x32xf32> to vector<32xf32>
    %106 = vector.shape_cast %105 : vector<32xf32> to vector<1x32xf32>
    %107 = vector.extract_strided_slice %22 {offsets = [0, 32], sizes = [8, 32], strides = [1, 1]} : vector<8x64xf32> to vector<8x32xf32>
    %cst_38 = arith.constant dense<0.000000e+00> : vector<8x32xf32>
    %108 = tpu.matmul %88, %107, %cst_38 {dimension_numbers = #tpu.dot_dimension_numbers<[1], [0], [0], [1], [0, 0, 1, 1], [], []>} : vector<8x8xf32>, vector<8x32xf32>, vector<8x32xf32> -> vector<8x32xf32>
    %109 = vector.broadcast %106 : vector<1x32xf32> to vector<8x32xf32>
    %110 = arith.addf %108, %109 : vector<8x32xf32>
    %111 = vector.extract_strided_slice %23 {offsets = [0, 32], sizes = [8, 32], strides = [1, 1]} : vector<8x64xf32> to vector<8x32xf32>
    %112 = arith.addf %110, %111 : vector<8x32xf32>
    %c0_39 = arith.constant 0 : index
    %c32 = arith.constant 32 : index
    %113 = vector.load %arg6[%c0_39, %c32] : memref<32x64xf32, #tpu.memory_space<vmem>>, vector<8x32xf32>
    tpu.vector_store %arg6[%c0_39, %c32], %112 {strides = array<i32>} : memref<32x64xf32, #tpu.memory_space<vmem>>, vector<8x32xf32>,
    %114 = vector.extract_strided_slice %18 {offsets = [8, 0], sizes = [8, 64], strides = [1, 1]} : vector<32x64xf32> to vector<8x64xf32>
    %115 = vector.extract_strided_slice %12 {offsets = [8, 0], sizes = [8, 64], strides = [1, 1]} : vector<32x64xf32> to vector<8x64xf32>
    %116 = vector.extract_strided_slice %17 {offsets = [8, 0], sizes = [8, 64], strides = [1, 1]} : vector<32x64xf32> to vector<8x64xf32>
    %117 = vector.extract_strided_slice %19 {offsets = [8, 0], sizes = [8, 64], strides = [1, 1]} : vector<32x64xf32> to vector<8x64xf32>
    %cst_40 = arith.constant dense<0.000000e+00> : vector<64xf32>
    %118 = vector.multi_reduction <add>, %114, %cst_40 [0] : vector<8x64xf32> to vector<64xf32>
    %119 = vector.shape_cast %118 : vector<64xf32> to vector<1x64xf32>
    %cst_41 = arith.constant 8.000000e+00 : f32
    %120 = vector.broadcast %cst_41 : f32 to vector<1x64xf32>
    %121 = arith.divf %119, %120 : vector<1x64xf32>
    %cst_42 = arith.constant dense<0.000000e+00> : vector<64xf32>
    %122 = vector.multi_reduction <add>, %115, %cst_42 [0] : vector<8x64xf32> to vector<64xf32>
    %123 = vector.shape_cast %122 : vector<64xf32> to vector<1x64xf32>
    %cst_43 = arith.constant 8.000000e+00 : f32
    %124 = vector.broadcast %cst_43 : f32 to vector<1x64xf32>
    %125 = arith.divf %123, %124 : vector<1x64xf32>
    %126 = vector.broadcast %121 : vector<1x64xf32> to vector<8x64xf32>
    %127 = arith.subf %114, %126 : vector<8x64xf32>
    %128 = vector.broadcast %125 : vector<1x64xf32> to vector<8x64xf32>
    %129 = arith.subf %115, %128 : vector<8x64xf32>
    %130 = vector.broadcast %121 : vector<1x64xf32> to vector<8x64xf32>
    %131 = arith.mulf %115, %130 : vector<8x64xf32>
    %132 = vector.extract_strided_slice %127 {offsets = [0, 0], sizes = [8, 32], strides = [1, 1]} : vector<8x64xf32> to vector<8x32xf32>
    %133 = vector.extract_strided_slice %129 {offsets = [0, 0], sizes = [8, 32], strides = [1, 1]} : vector<8x64xf32> to vector<8x32xf32>
    %cst_44 = arith.constant dense<0.000000e+00> : vector<8x8xf32>
    %134 = tpu.matmul %132, %133, %cst_44 {dimension_numbers = #tpu.dot_dimension_numbers<[1], [1], [0], [0], [0, 0, 1, 0], [], []>} : vector<8x32xf32>, vector<8x32xf32>, vector<8x8xf32> -> vector<8x8xf32>
    %cst_45 = arith.constant dense<0xFF800000> : vector<8xf32>
    %135 = vector.multi_reduction <maximumf>, %134, %cst_45 [1] : vector<8x8xf32> to vector<8xf32>
    %136 = vector.shape_cast %135 : vector<8xf32> to vector<8x1xf32>
    %137 = vector.broadcast %136 : vector<8x1xf32> to vector<8x8xf32>
    %138 = arith.subf %134, %137 : vector<8x8xf32>
    %139 = math.exp %138 : vector<8x8xf32>
    %cst_46 = arith.constant dense<0.000000e+00> : vector<8xf32>
    %140 = vector.multi_reduction <add>, %139, %cst_46 [1] : vector<8x8xf32> to vector<8xf32>
    %141 = vector.shape_cast %140 : vector<8xf32> to vector<8x1xf32>
    %142 = tpu.reciprocal %141 {approx = true} : vector<8x1xf32> -> vector<8x1xf32>
    %143 = vector.broadcast %142 : vector<8x1xf32> to vector<8x8xf32>
    %144 = arith.mulf %139, %143 : vector<8x8xf32>
    %145 = vector.extract_strided_slice %131 {offsets = [0, 0], sizes = [8, 32], strides = [1, 1]} : vector<8x64xf32> to vector<8x32xf32>
    %cst_47 = arith.constant dense<0.000000e+00> : vector<8xf32>
    %146 = vector.multi_reduction <add>, %145, %cst_47 [1] : vector<8x32xf32> to vector<8xf32>
    %147 = vector.shape_cast %146 : vector<8xf32> to vector<8x1xf32>
    %cst_48 = arith.constant dense<0xFF800000> : vector<1xf32>
    %148 = vector.multi_reduction <maximumf>, %147, %cst_48 [0] : vector<8x1xf32> to vector<1xf32>
    %149 = vector.shape_cast %148 : vector<1xf32> to vector<1x1xf32>
    %150 = vector.broadcast %149 : vector<1x1xf32> to vector<8x1xf32>
    %151 = arith.subf %147, %150 : vector<8x1xf32>
    %152 = math.exp %151 : vector<8x1xf32>
    %cst_49 = arith.constant dense<0.000000e+00> : vector<1xf32>
    %153 = vector.multi_reduction <add>, %152, %cst_49 [0] : vector<8x1xf32> to vector<1xf32>
    %154 = vector.shape_cast %153 : vector<1xf32> to vector<1x1xf32>
    %155 = tpu.reciprocal %154 {approx = true} : vector<1x1xf32> -> vector<1x1xf32>
    %156 = vector.broadcast %155 : vector<1x1xf32> to vector<8x1xf32>
    %157 = arith.mulf %152, %156 : vector<8x1xf32>
    %158 = vector.extract_strided_slice %116 {offsets = [0, 0], sizes = [8, 32], strides = [1, 1]} : vector<8x64xf32> to vector<8x32xf32>
    %159 = vector.broadcast %157 : vector<8x1xf32> to vector<8x32xf32>
    %160 = arith.mulf %159, %158 : vector<8x32xf32>
    %cst_50 = arith.constant dense<0.000000e+00> : vector<32xf32>
    %161 = vector.multi_reduction <add>, %160, %cst_50 [0] : vector<8x32xf32> to vector<32xf32>
    %162 = vector.shape_cast %161 : vector<32xf32> to vector<1x32xf32>
    %163 = vector.extract_strided_slice %116 {offsets = [0, 0], sizes = [8, 32], strides = [1, 1]} : vector<8x64xf32> to vector<8x32xf32>
    %cst_51 = arith.constant dense<0.000000e+00> : vector<8x32xf32>
    %164 = tpu.matmul %144, %163, %cst_51 {dimension_numbers = #tpu.dot_dimension_numbers<[1], [0], [0], [1], [0, 0, 1, 1], [], []>} : vector<8x8xf32>, vector<8x32xf32>, vector<8x32xf32> -> vector<8x32xf32>
    %165 = vector.broadcast %162 : vector<1x32xf32> to vector<8x32xf32>
    %166 = arith.addf %164, %165 : vector<8x32xf32>
    %167 = vector.extract_strided_slice %117 {offsets = [0, 0], sizes = [8, 32], strides = [1, 1]} : vector<8x64xf32> to vector<8x32xf32>
    %168 = arith.addf %166, %167 : vector<8x32xf32>
    %c8 = arith.constant 8 : index
    %c0_52 = arith.constant 0 : index
    %169 = vector.load %arg6[%c8, %c0_52] : memref<32x64xf32, #tpu.memory_space<vmem>>, vector<8x32xf32>
    tpu.vector_store %arg6[%c8, %c0_52], %168 {strides = array<i32>} : memref<32x64xf32, #tpu.memory_space<vmem>>, vector<8x32xf32>,
    %170 = vector.extract_strided_slice %127 {offsets = [0, 32], sizes = [8, 32], strides = [1, 1]} : vector<8x64xf32> to vector<8x32xf32>
    %171 = vector.extract_strided_slice %129 {offsets = [0, 32], sizes = [8, 32], strides = [1, 1]} : vector<8x64xf32> to vector<8x32xf32>
    %cst_53 = arith.constant dense<0.000000e+00> : vector<8x8xf32>
    %172 = tpu.matmul %170, %171, %cst_53 {dimension_numbers = #tpu.dot_dimension_numbers<[1], [1], [0], [0], [0, 0, 1, 0], [], []>} : vector<8x32xf32>, vector<8x32xf32>, vector<8x8xf32> -> vector<8x8xf32>
    %cst_54 = arith.constant dense<0xFF800000> : vector<8xf32>
    %173 = vector.multi_reduction <maximumf>, %172, %cst_54 [1] : vector<8x8xf32> to vector<8xf32>
    %174 = vector.shape_cast %173 : vector<8xf32> to vector<8x1xf32>
    %175 = vector.broadcast %174 : vector<8x1xf32> to vector<8x8xf32>
    %176 = arith.subf %172, %175 : vector<8x8xf32>
    %177 = math.exp %176 : vector<8x8xf32>
    %cst_55 = arith.constant dense<0.000000e+00> : vector<8xf32>
    %178 = vector.multi_reduction <add>, %177, %cst_55 [1] : vector<8x8xf32> to vector<8xf32>
    %179 = vector.shape_cast %178 : vector<8xf32> to vector<8x1xf32>
    %180 = tpu.reciprocal %179 {approx = true} : vector<8x1xf32> -> vector<8x1xf32>
    %181 = vector.broadcast %180 : vector<8x1xf32> to vector<8x8xf32>
    %182 = arith.mulf %177, %181 : vector<8x8xf32>
    %183 = vector.extract_strided_slice %131 {offsets = [0, 32], sizes = [8, 32], strides = [1, 1]} : vector<8x64xf32> to vector<8x32xf32>
    %cst_56 = arith.constant dense<0.000000e+00> : vector<8xf32>
    %184 = vector.multi_reduction <add>, %183, %cst_56 [1] : vector<8x32xf32> to vector<8xf32>
    %185 = vector.shape_cast %184 : vector<8xf32> to vector<8x1xf32>
    %cst_57 = arith.constant dense<0xFF800000> : vector<1xf32>
    %186 = vector.multi_reduction <maximumf>, %185, %cst_57 [0] : vector<8x1xf32> to vector<1xf32>
    %187 = vector.shape_cast %186 : vector<1xf32> to vector<1x1xf32>
    %188 = vector.broadcast %187 : vector<1x1xf32> to vector<8x1xf32>
    %189 = arith.subf %185, %188 : vector<8x1xf32>
    %190 = math.exp %189 : vector<8x1xf32>
    %cst_58 = arith.constant dense<0.000000e+00> : vector<1xf32>
    %191 = vector.multi_reduction <add>, %190, %cst_58 [0] : vector<8x1xf32> to vector<1xf32>
    %192 = vector.shape_cast %191 : vector<1xf32> to vector<1x1xf32>
    %193 = tpu.reciprocal %192 {approx = true} : vector<1x1xf32> -> vector<1x1xf32>
    %194 = vector.broadcast %193 : vector<1x1xf32> to vector<8x1xf32>
    %195 = arith.mulf %190, %194 : vector<8x1xf32>
    %196 = vector.extract_strided_slice %116 {offsets = [0, 32], sizes = [8, 32], strides = [1, 1]} : vector<8x64xf32> to vector<8x32xf32>
    %197 = vector.broadcast %195 : vector<8x1xf32> to vector<8x32xf32>
    %198 = arith.mulf %197, %196 : vector<8x32xf32>
    %cst_59 = arith.constant dense<0.000000e+00> : vector<32xf32>
    %199 = vector.multi_reduction <add>, %198, %cst_59 [0] : vector<8x32xf32> to vector<32xf32>
    %200 = vector.shape_cast %199 : vector<32xf32> to vector<1x32xf32>
    %201 = vector.extract_strided_slice %116 {offsets = [0, 32], sizes = [8, 32], strides = [1, 1]} : vector<8x64xf32> to vector<8x32xf32>
    %cst_60 = arith.constant dense<0.000000e+00> : vector<8x32xf32>
    %202 = tpu.matmul %182, %201, %cst_60 {dimension_numbers = #tpu.dot_dimension_numbers<[1], [0], [0], [1], [0, 0, 1, 1], [], []>} : vector<8x8xf32>, vector<8x32xf32>, vector<8x32xf32> -> vector<8x32xf32>
    %203 = vector.broadcast %200 : vector<1x32xf32> to vector<8x32xf32>
    %204 = arith.addf %202, %203 : vector<8x32xf32>
    %205 = vector.extract_strided_slice %117 {offsets = [0, 32], sizes = [8, 32], strides = [1, 1]} : vector<8x64xf32> to vector<8x32xf32>
    %206 = arith.addf %204, %205 : vector<8x32xf32>
    %c8_61 = arith.constant 8 : index
    %c32_62 = arith.constant 32 : index
    %207 = vector.load %arg6[%c8_61, %c32_62] : memref<32x64xf32, #tpu.memory_space<vmem>>, vector<8x32xf32>
    tpu.vector_store %arg6[%c8_61, %c32_62], %206 {strides = array<i32>} : memref<32x64xf32, #tpu.memory_space<vmem>>, vector<8x32xf32>,
    %208 = vector.extract_strided_slice %18 {offsets = [16, 0], sizes = [8, 64], strides = [1, 1]} : vector<32x64xf32> to vector<8x64xf32>
    %209 = vector.extract_strided_slice %12 {offsets = [16, 0], sizes = [8, 64], strides = [1, 1]} : vector<32x64xf32> to vector<8x64xf32>
    %210 = vector.extract_strided_slice %17 {offsets = [16, 0], sizes = [8, 64], strides = [1, 1]} : vector<32x64xf32> to vector<8x64xf32>
    %211 = vector.extract_strided_slice %19 {offsets = [16, 0], sizes = [8, 64], strides = [1, 1]} : vector<32x64xf32> to vector<8x64xf32>
    %cst_63 = arith.constant dense<0.000000e+00> : vector<64xf32>
    %212 = vector.multi_reduction <add>, %208, %cst_63 [0] : vector<8x64xf32> to vector<64xf32>
    %213 = vector.shape_cast %212 : vector<64xf32> to vector<1x64xf32>
    %cst_64 = arith.constant 8.000000e+00 : f32
    %214 = vector.broadcast %cst_64 : f32 to vector<1x64xf32>
    %215 = arith.divf %213, %214 : vector<1x64xf32>
    %cst_65 = arith.constant dense<0.000000e+00> : vector<64xf32>
    %216 = vector.multi_reduction <add>, %209, %cst_65 [0] : vector<8x64xf32> to vector<64xf32>
    %217 = vector.shape_cast %216 : vector<64xf32> to vector<1x64xf32>
    %cst_66 = arith.constant 8.000000e+00 : f32
    %218 = vector.broadcast %cst_66 : f32 to vector<1x64xf32>
    %219 = arith.divf %217, %218 : vector<1x64xf32>
    %220 = vector.broadcast %215 : vector<1x64xf32> to vector<8x64xf32>
    %221 = arith.subf %208, %220 : vector<8x64xf32>
    %222 = vector.broadcast %219 : vector<1x64xf32> to vector<8x64xf32>
    %223 = arith.subf %209, %222 : vector<8x64xf32>
    %224 = vector.broadcast %215 : vector<1x64xf32> to vector<8x64xf32>
    %225 = arith.mulf %209, %224 : vector<8x64xf32>
    %226 = vector.extract_strided_slice %221 {offsets = [0, 0], sizes = [8, 32], strides = [1, 1]} : vector<8x64xf32> to vector<8x32xf32>
    %227 = vector.extract_strided_slice %223 {offsets = [0, 0], sizes = [8, 32], strides = [1, 1]} : vector<8x64xf32> to vector<8x32xf32>
    %cst_67 = arith.constant dense<0.000000e+00> : vector<8x8xf32>
    %228 = tpu.matmul %226, %227, %cst_67 {dimension_numbers = #tpu.dot_dimension_numbers<[1], [1], [0], [0], [0, 0, 1, 0], [], []>} : vector<8x32xf32>, vector<8x32xf32>, vector<8x8xf32> -> vector<8x8xf32>
    %cst_68 = arith.constant dense<0xFF800000> : vector<8xf32>
    %229 = vector.multi_reduction <maximumf>, %228, %cst_68 [1] : vector<8x8xf32> to vector<8xf32>
    %230 = vector.shape_cast %229 : vector<8xf32> to vector<8x1xf32>
    %231 = vector.broadcast %230 : vector<8x1xf32> to vector<8x8xf32>
    %232 = arith.subf %228, %231 : vector<8x8xf32>
    %233 = math.exp %232 : vector<8x8xf32>
    %cst_69 = arith.constant dense<0.000000e+00> : vector<8xf32>
    %234 = vector.multi_reduction <add>, %233, %cst_69 [1] : vector<8x8xf32> to vector<8xf32>
    %235 = vector.shape_cast %234 : vector<8xf32> to vector<8x1xf32>
    %236 = tpu.reciprocal %235 {approx = true} : vector<8x1xf32> -> vector<8x1xf32>
    %237 = vector.broadcast %236 : vector<8x1xf32> to vector<8x8xf32>
    %238 = arith.mulf %233, %237 : vector<8x8xf32>
    %239 = vector.extract_strided_slice %225 {offsets = [0, 0], sizes = [8, 32], strides = [1, 1]} : vector<8x64xf32> to vector<8x32xf32>
    %cst_70 = arith.constant dense<0.000000e+00> : vector<8xf32>
    %240 = vector.multi_reduction <add>, %239, %cst_70 [1] : vector<8x32xf32> to vector<8xf32>
    %241 = vector.shape_cast %240 : vector<8xf32> to vector<8x1xf32>
    %cst_71 = arith.constant dense<0xFF800000> : vector<1xf32>
    %242 = vector.multi_reduction <maximumf>, %241, %cst_71 [0] : vector<8x1xf32> to vector<1xf32>
    %243 = vector.shape_cast %242 : vector<1xf32> to vector<1x1xf32>
    %244 = vector.broadcast %243 : vector<1x1xf32> to vector<8x1xf32>
    %245 = arith.subf %241, %244 : vector<8x1xf32>
    %246 = math.exp %245 : vector<8x1xf32>
    %cst_72 = arith.constant dense<0.000000e+00> : vector<1xf32>
    %247 = vector.multi_reduction <add>, %246, %cst_72 [0] : vector<8x1xf32> to vector<1xf32>
    %248 = vector.shape_cast %247 : vector<1xf32> to vector<1x1xf32>
    %249 = tpu.reciprocal %248 {approx = true} : vector<1x1xf32> -> vector<1x1xf32>
    %250 = vector.broadcast %249 : vector<1x1xf32> to vector<8x1xf32>
    %251 = arith.mulf %246, %250 : vector<8x1xf32>
    %252 = vector.extract_strided_slice %210 {offsets = [0, 0], sizes = [8, 32], strides = [1, 1]} : vector<8x64xf32> to vector<8x32xf32>
    %253 = vector.broadcast %251 : vector<8x1xf32> to vector<8x32xf32>
    %254 = arith.mulf %253, %252 : vector<8x32xf32>
    %cst_73 = arith.constant dense<0.000000e+00> : vector<32xf32>
    %255 = vector.multi_reduction <add>, %254, %cst_73 [0] : vector<8x32xf32> to vector<32xf32>
    %256 = vector.shape_cast %255 : vector<32xf32> to vector<1x32xf32>
    %257 = vector.extract_strided_slice %210 {offsets = [0, 0], sizes = [8, 32], strides = [1, 1]} : vector<8x64xf32> to vector<8x32xf32>
    %cst_74 = arith.constant dense<0.000000e+00> : vector<8x32xf32>
    %258 = tpu.matmul %238, %257, %cst_74 {dimension_numbers = #tpu.dot_dimension_numbers<[1], [0], [0], [1], [0, 0, 1, 1], [], []>} : vector<8x8xf32>, vector<8x32xf32>, vector<8x32xf32> -> vector<8x32xf32>
    %259 = vector.broadcast %256 : vector<1x32xf32> to vector<8x32xf32>
    %260 = arith.addf %258, %259 : vector<8x32xf32>
    %261 = vector.extract_strided_slice %211 {offsets = [0, 0], sizes = [8, 32], strides = [1, 1]} : vector<8x64xf32> to vector<8x32xf32>
    %262 = arith.addf %260, %261 : vector<8x32xf32>
    %c16 = arith.constant 16 : index
    %c0_75 = arith.constant 0 : index
    %263 = vector.load %arg6[%c16, %c0_75] : memref<32x64xf32, #tpu.memory_space<vmem>>, vector<8x32xf32>
    tpu.vector_store %arg6[%c16, %c0_75], %262 {strides = array<i32>} : memref<32x64xf32, #tpu.memory_space<vmem>>, vector<8x32xf32>,
    %264 = vector.extract_strided_slice %221 {offsets = [0, 32], sizes = [8, 32], strides = [1, 1]} : vector<8x64xf32> to vector<8x32xf32>
    %265 = vector.extract_strided_slice %223 {offsets = [0, 32], sizes = [8, 32], strides = [1, 1]} : vector<8x64xf32> to vector<8x32xf32>
    %cst_76 = arith.constant dense<0.000000e+00> : vector<8x8xf32>
    %266 = tpu.matmul %264, %265, %cst_76 {dimension_numbers = #tpu.dot_dimension_numbers<[1], [1], [0], [0], [0, 0, 1, 0], [], []>} : vector<8x32xf32>, vector<8x32xf32>, vector<8x8xf32> -> vector<8x8xf32>
    %cst_77 = arith.constant dense<0xFF800000> : vector<8xf32>
    %267 = vector.multi_reduction <maximumf>, %266, %cst_77 [1] : vector<8x8xf32> to vector<8xf32>
    %268 = vector.shape_cast %267 : vector<8xf32> to vector<8x1xf32>
    %269 = vector.broadcast %268 : vector<8x1xf32> to vector<8x8xf32>
    %270 = arith.subf %266, %269 : vector<8x8xf32>
    %271 = math.exp %270 : vector<8x8xf32>
    %cst_78 = arith.constant dense<0.000000e+00> : vector<8xf32>
    %272 = vector.multi_reduction <add>, %271, %cst_78 [1] : vector<8x8xf32> to vector<8xf32>
    %273 = vector.shape_cast %272 : vector<8xf32> to vector<8x1xf32>
    %274 = tpu.reciprocal %273 {approx = true} : vector<8x1xf32> -> vector<8x1xf32>
    %275 = vector.broadcast %274 : vector<8x1xf32> to vector<8x8xf32>
    %276 = arith.mulf %271, %275 : vector<8x8xf32>
    %277 = vector.extract_strided_slice %225 {offsets = [0, 32], sizes = [8, 32], strides = [1, 1]} : vector<8x64xf32> to vector<8x32xf32>
    %cst_79 = arith.constant dense<0.000000e+00> : vector<8xf32>
    %278 = vector.multi_reduction <add>, %277, %cst_79 [1] : vector<8x32xf32> to vector<8xf32>
    %279 = vector.shape_cast %278 : vector<8xf32> to vector<8x1xf32>
    %cst_80 = arith.constant dense<0xFF800000> : vector<1xf32>
    %280 = vector.multi_reduction <maximumf>, %279, %cst_80 [0] : vector<8x1xf32> to vector<1xf32>
    %281 = vector.shape_cast %280 : vector<1xf32> to vector<1x1xf32>
    %282 = vector.broadcast %281 : vector<1x1xf32> to vector<8x1xf32>
    %283 = arith.subf %279, %282 : vector<8x1xf32>
    %284 = math.exp %283 : vector<8x1xf32>
    %cst_81 = arith.constant dense<0.000000e+00> : vector<1xf32>
    %285 = vector.multi_reduction <add>, %284, %cst_81 [0] : vector<8x1xf32> to vector<1xf32>
    %286 = vector.shape_cast %285 : vector<1xf32> to vector<1x1xf32>
    %287 = tpu.reciprocal %286 {approx = true} : vector<1x1xf32> -> vector<1x1xf32>
    %288 = vector.broadcast %287 : vector<1x1xf32> to vector<8x1xf32>
    %289 = arith.mulf %284, %288 : vector<8x1xf32>
    %290 = vector.extract_strided_slice %210 {offsets = [0, 32], sizes = [8, 32], strides = [1, 1]} : vector<8x64xf32> to vector<8x32xf32>
    %291 = vector.broadcast %289 : vector<8x1xf32> to vector<8x32xf32>
    %292 = arith.mulf %291, %290 : vector<8x32xf32>
    %cst_82 = arith.constant dense<0.000000e+00> : vector<32xf32>
    %293 = vector.multi_reduction <add>, %292, %cst_82 [0] : vector<8x32xf32> to vector<32xf32>
    %294 = vector.shape_cast %293 : vector<32xf32> to vector<1x32xf32>
    %295 = vector.extract_strided_slice %210 {offsets = [0, 32], sizes = [8, 32], strides = [1, 1]} : vector<8x64xf32> to vector<8x32xf32>
    %cst_83 = arith.constant dense<0.000000e+00> : vector<8x32xf32>
    %296 = tpu.matmul %276, %295, %cst_83 {dimension_numbers = #tpu.dot_dimension_numbers<[1], [0], [0], [1], [0, 0, 1, 1], [], []>} : vector<8x8xf32>, vector<8x32xf32>, vector<8x32xf32> -> vector<8x32xf32>
    %297 = vector.broadcast %294 : vector<1x32xf32> to vector<8x32xf32>
    %298 = arith.addf %296, %297 : vector<8x32xf32>
    %299 = vector.extract_strided_slice %211 {offsets = [0, 32], sizes = [8, 32], strides = [1, 1]} : vector<8x64xf32> to vector<8x32xf32>
    %300 = arith.addf %298, %299 : vector<8x32xf32>
    %c16_84 = arith.constant 16 : index
    %c32_85 = arith.constant 32 : index
    %301 = vector.load %arg6[%c16_84, %c32_85] : memref<32x64xf32, #tpu.memory_space<vmem>>, vector<8x32xf32>
    tpu.vector_store %arg6[%c16_84, %c32_85], %300 {strides = array<i32>} : memref<32x64xf32, #tpu.memory_space<vmem>>, vector<8x32xf32>,
    %302 = vector.extract_strided_slice %18 {offsets = [24, 0], sizes = [8, 64], strides = [1, 1]} : vector<32x64xf32> to vector<8x64xf32>
    %303 = vector.extract_strided_slice %12 {offsets = [24, 0], sizes = [8, 64], strides = [1, 1]} : vector<32x64xf32> to vector<8x64xf32>
    %304 = vector.extract_strided_slice %17 {offsets = [24, 0], sizes = [8, 64], strides = [1, 1]} : vector<32x64xf32> to vector<8x64xf32>
    %305 = vector.extract_strided_slice %19 {offsets = [24, 0], sizes = [8, 64], strides = [1, 1]} : vector<32x64xf32> to vector<8x64xf32>
    %cst_86 = arith.constant dense<0.000000e+00> : vector<64xf32>
    %306 = vector.multi_reduction <add>, %302, %cst_86 [0] : vector<8x64xf32> to vector<64xf32>
    %307 = vector.shape_cast %306 : vector<64xf32> to vector<1x64xf32>
    %cst_87 = arith.constant 8.000000e+00 : f32
    %308 = vector.broadcast %cst_87 : f32 to vector<1x64xf32>
    %309 = arith.divf %307, %308 : vector<1x64xf32>
    %cst_88 = arith.constant dense<0.000000e+00> : vector<64xf32>
    %310 = vector.multi_reduction <add>, %303, %cst_88 [0] : vector<8x64xf32> to vector<64xf32>
    %311 = vector.shape_cast %310 : vector<64xf32> to vector<1x64xf32>
    %cst_89 = arith.constant 8.000000e+00 : f32
    %312 = vector.broadcast %cst_89 : f32 to vector<1x64xf32>
    %313 = arith.divf %311, %312 : vector<1x64xf32>
    %314 = vector.broadcast %309 : vector<1x64xf32> to vector<8x64xf32>
    %315 = arith.subf %302, %314 : vector<8x64xf32>
    %316 = vector.broadcast %313 : vector<1x64xf32> to vector<8x64xf32>
    %317 = arith.subf %303, %316 : vector<8x64xf32>
    %318 = vector.broadcast %309 : vector<1x64xf32> to vector<8x64xf32>
    %319 = arith.mulf %303, %318 : vector<8x64xf32>
    %320 = vector.extract_strided_slice %315 {offsets = [0, 0], sizes = [8, 32], strides = [1, 1]} : vector<8x64xf32> to vector<8x32xf32>
    %321 = vector.extract_strided_slice %317 {offsets = [0, 0], sizes = [8, 32], strides = [1, 1]} : vector<8x64xf32> to vector<8x32xf32>
    %cst_90 = arith.constant dense<0.000000e+00> : vector<8x8xf32>
    %322 = tpu.matmul %320, %321, %cst_90 {dimension_numbers = #tpu.dot_dimension_numbers<[1], [1], [0], [0], [0, 0, 1, 0], [], []>} : vector<8x32xf32>, vector<8x32xf32>, vector<8x8xf32> -> vector<8x8xf32>
    %cst_91 = arith.constant dense<0xFF800000> : vector<8xf32>
    %323 = vector.multi_reduction <maximumf>, %322, %cst_91 [1] : vector<8x8xf32> to vector<8xf32>
    %324 = vector.shape_cast %323 : vector<8xf32> to vector<8x1xf32>
    %325 = vector.broadcast %324 : vector<8x1xf32> to vector<8x8xf32>
    %326 = arith.subf %322, %325 : vector<8x8xf32>
    %327 = math.exp %326 : vector<8x8xf32>
    %cst_92 = arith.constant dense<0.000000e+00> : vector<8xf32>
    %328 = vector.multi_reduction <add>, %327, %cst_92 [1] : vector<8x8xf32> to vector<8xf32>
    %329 = vector.shape_cast %328 : vector<8xf32> to vector<8x1xf32>
    %330 = tpu.reciprocal %329 {approx = true} : vector<8x1xf32> -> vector<8x1xf32>
    %331 = vector.broadcast %330 : vector<8x1xf32> to vector<8x8xf32>
    %332 = arith.mulf %327, %331 : vector<8x8xf32>
    %333 = vector.extract_strided_slice %319 {offsets = [0, 0], sizes = [8, 32], strides = [1, 1]} : vector<8x64xf32> to vector<8x32xf32>
    %cst_93 = arith.constant dense<0.000000e+00> : vector<8xf32>
    %334 = vector.multi_reduction <add>, %333, %cst_93 [1] : vector<8x32xf32> to vector<8xf32>
    %335 = vector.shape_cast %334 : vector<8xf32> to vector<8x1xf32>
    %cst_94 = arith.constant dense<0xFF800000> : vector<1xf32>
    %336 = vector.multi_reduction <maximumf>, %335, %cst_94 [0] : vector<8x1xf32> to vector<1xf32>
    %337 = vector.shape_cast %336 : vector<1xf32> to vector<1x1xf32>
    %338 = vector.broadcast %337 : vector<1x1xf32> to vector<8x1xf32>
    %339 = arith.subf %335, %338 : vector<8x1xf32>
    %340 = math.exp %339 : vector<8x1xf32>
    %cst_95 = arith.constant dense<0.000000e+00> : vector<1xf32>
    %341 = vector.multi_reduction <add>, %340, %cst_95 [0] : vector<8x1xf32> to vector<1xf32>
    %342 = vector.shape_cast %341 : vector<1xf32> to vector<1x1xf32>
    %343 = tpu.reciprocal %342 {approx = true} : vector<1x1xf32> -> vector<1x1xf32>
    %344 = vector.broadcast %343 : vector<1x1xf32> to vector<8x1xf32>
    %345 = arith.mulf %340, %344 : vector<8x1xf32>
    %346 = vector.extract_strided_slice %304 {offsets = [0, 0], sizes = [8, 32], strides = [1, 1]} : vector<8x64xf32> to vector<8x32xf32>
    %347 = vector.broadcast %345 : vector<8x1xf32> to vector<8x32xf32>
    %348 = arith.mulf %347, %346 : vector<8x32xf32>
    %cst_96 = arith.constant dense<0.000000e+00> : vector<32xf32>
    %349 = vector.multi_reduction <add>, %348, %cst_96 [0] : vector<8x32xf32> to vector<32xf32>
    %350 = vector.shape_cast %349 : vector<32xf32> to vector<1x32xf32>
    %351 = vector.extract_strided_slice %304 {offsets = [0, 0], sizes = [8, 32], strides = [1, 1]} : vector<8x64xf32> to vector<8x32xf32>
    %cst_97 = arith.constant dense<0.000000e+00> : vector<8x32xf32>
    %352 = tpu.matmul %332, %351, %cst_97 {dimension_numbers = #tpu.dot_dimension_numbers<[1], [0], [0], [1], [0, 0, 1, 1], [], []>} : vector<8x8xf32>, vector<8x32xf32>, vector<8x32xf32> -> vector<8x32xf32>
    %353 = vector.broadcast %350 : vector<1x32xf32> to vector<8x32xf32>
    %354 = arith.addf %352, %353 : vector<8x32xf32>
    %355 = vector.extract_strided_slice %305 {offsets = [0, 0], sizes = [8, 32], strides = [1, 1]} : vector<8x64xf32> to vector<8x32xf32>
    %356 = arith.addf %354, %355 : vector<8x32xf32>
    %c24 = arith.constant 24 : index
    %c0_98 = arith.constant 0 : index
    %357 = vector.load %arg6[%c24, %c0_98] : memref<32x64xf32, #tpu.memory_space<vmem>>, vector<8x32xf32>
    tpu.vector_store %arg6[%c24, %c0_98], %356 {strides = array<i32>} : memref<32x64xf32, #tpu.memory_space<vmem>>, vector<8x32xf32>,
    %358 = vector.extract_strided_slice %315 {offsets = [0, 32], sizes = [8, 32], strides = [1, 1]} : vector<8x64xf32> to vector<8x32xf32>
    %359 = vector.extract_strided_slice %317 {offsets = [0, 32], sizes = [8, 32], strides = [1, 1]} : vector<8x64xf32> to vector<8x32xf32>
    %cst_99 = arith.constant dense<0.000000e+00> : vector<8x8xf32>
    %360 = tpu.matmul %358, %359, %cst_99 {dimension_numbers = #tpu.dot_dimension_numbers<[1], [1], [0], [0], [0, 0, 1, 0], [], []>} : vector<8x32xf32>, vector<8x32xf32>, vector<8x8xf32> -> vector<8x8xf32>
    %cst_100 = arith.constant dense<0xFF800000> : vector<8xf32>
    %361 = vector.multi_reduction <maximumf>, %360, %cst_100 [1] : vector<8x8xf32> to vector<8xf32>
    %362 = vector.shape_cast %361 : vector<8xf32> to vector<8x1xf32>
    %363 = vector.broadcast %362 : vector<8x1xf32> to vector<8x8xf32>
    %364 = arith.subf %360, %363 : vector<8x8xf32>
    %365 = math.exp %364 : vector<8x8xf32>
    %cst_101 = arith.constant dense<0.000000e+00> : vector<8xf32>
    %366 = vector.multi_reduction <add>, %365, %cst_101 [1] : vector<8x8xf32> to vector<8xf32>
    %367 = vector.shape_cast %366 : vector<8xf32> to vector<8x1xf32>
    %368 = tpu.reciprocal %367 {approx = true} : vector<8x1xf32> -> vector<8x1xf32>
    %369 = vector.broadcast %368 : vector<8x1xf32> to vector<8x8xf32>
    %370 = arith.mulf %365, %369 : vector<8x8xf32>
    %371 = vector.extract_strided_slice %319 {offsets = [0, 32], sizes = [8, 32], strides = [1, 1]} : vector<8x64xf32> to vector<8x32xf32>
    %cst_102 = arith.constant dense<0.000000e+00> : vector<8xf32>
    %372 = vector.multi_reduction <add>, %371, %cst_102 [1] : vector<8x32xf32> to vector<8xf32>
    %373 = vector.shape_cast %372 : vector<8xf32> to vector<8x1xf32>
    %cst_103 = arith.constant dense<0xFF800000> : vector<1xf32>
    %374 = vector.multi_reduction <maximumf>, %373, %cst_103 [0] : vector<8x1xf32> to vector<1xf32>
    %375 = vector.shape_cast %374 : vector<1xf32> to vector<1x1xf32>
    %376 = vector.broadcast %375 : vector<1x1xf32> to vector<8x1xf32>
    %377 = arith.subf %373, %376 : vector<8x1xf32>
    %378 = math.exp %377 : vector<8x1xf32>
    %cst_104 = arith.constant dense<0.000000e+00> : vector<1xf32>
    %379 = vector.multi_reduction <add>, %378, %cst_104 [0] : vector<8x1xf32> to vector<1xf32>
    %380 = vector.shape_cast %379 : vector<1xf32> to vector<1x1xf32>
    %381 = tpu.reciprocal %380 {approx = true} : vector<1x1xf32> -> vector<1x1xf32>
    %382 = vector.broadcast %381 : vector<1x1xf32> to vector<8x1xf32>
    %383 = arith.mulf %378, %382 : vector<8x1xf32>
    %384 = vector.extract_strided_slice %304 {offsets = [0, 32], sizes = [8, 32], strides = [1, 1]} : vector<8x64xf32> to vector<8x32xf32>
    %385 = vector.broadcast %383 : vector<8x1xf32> to vector<8x32xf32>
    %386 = arith.mulf %385, %384 : vector<8x32xf32>
    %cst_105 = arith.constant dense<0.000000e+00> : vector<32xf32>
    %387 = vector.multi_reduction <add>, %386, %cst_105 [0] : vector<8x32xf32> to vector<32xf32>
    %388 = vector.shape_cast %387 : vector<32xf32> to vector<1x32xf32>
    %389 = vector.extract_strided_slice %304 {offsets = [0, 32], sizes = [8, 32], strides = [1, 1]} : vector<8x64xf32> to vector<8x32xf32>
    %cst_106 = arith.constant dense<0.000000e+00> : vector<8x32xf32>
    %390 = tpu.matmul %370, %389, %cst_106 {dimension_numbers = #tpu.dot_dimension_numbers<[1], [0], [0], [1], [0, 0, 1, 1], [], []>} : vector<8x8xf32>, vector<8x32xf32>, vector<8x32xf32> -> vector<8x32xf32>
    %391 = vector.broadcast %388 : vector<1x32xf32> to vector<8x32xf32>
    %392 = arith.addf %390, %391 : vector<8x32xf32>
    %393 = vector.extract_strided_slice %305 {offsets = [0, 32], sizes = [8, 32], strides = [1, 1]} : vector<8x64xf32> to vector<8x32xf32>
    %394 = arith.addf %392, %393 : vector<8x32xf32>
    %c24_107 = arith.constant 24 : index
    %c32_108 = arith.constant 32 : index
    %395 = vector.load %arg6[%c24_107, %c32_108] : memref<32x64xf32, #tpu.memory_space<vmem>>, vector<8x32xf32>
    tpu.vector_store %arg6[%c24_107, %c32_108], %394 {strides = array<i32>} : memref<32x64xf32, #tpu.memory_space<vmem>>, vector<8x32xf32>,
    return
  }
  func.func @transform_0(%arg0: i32) -> (i32, i32) {
    %c0_i32 = arith.constant 0 : i32
    %c0_i32_0 = arith.constant 0 : i32
    return %arg0, %c0_i32 : i32, i32
  }
  func.func @transform_1(%arg0: i32) -> (i32, i32) {
    %c0_i32 = arith.constant 0 : i32
    %c0_i32_0 = arith.constant 0 : i32
    return %arg0, %c0_i32 : i32, i32
  }
  func.func @transform_2(%arg0: i32) -> (i32, i32) {
    %c0_i32 = arith.constant 0 : i32
    %c0_i32_0 = arith.constant 0 : i32
    return %arg0, %c0_i32 : i32, i32
  }
  func.func @transform_3(%arg0: i32) -> (i32, i32) {
    %c0_i32 = arith.constant 0 : i32
    %c0_i32_0 = arith.constant 0 : i32
    %c0_i32_1 = arith.constant 0 : i32
    return %c0_i32, %c0_i32_0 : i32, i32
  }
  func.func @transform_4(%arg0: i32) -> (i32, i32) {
    %c0_i32 = arith.constant 0 : i32
    %c0_i32_0 = arith.constant 0 : i32
    %c0_i32_1 = arith.constant 0 : i32
    return %c0_i32, %c0_i32_0 : i32, i32
  }
  func.func @transform_5(%arg0: i32) -> (i32, i32) {
    %c0_i32 = arith.constant 0 : i32
    %c0_i32_0 = arith.constant 0 : i32
    return %arg0, %c0_i32 : i32, i32
  }
}

</mosaic_0001>

<bundles_post_ra>
// kernel: tpu_custom_call.1
= control target key start
LH: loop header
LB: loop body
LE: loop exit
PB: predicated region body
PF: predicated region fallthrough
CT: control target
= control target key end

     0   :  { %10 = vsyncpa [#allocation3], 0  ;;  %s2113_s0 = inlined_call_operand.vmem [shape: bf16[64,16], index: 0, kind: input, shape index: {}]   ;;  %s2114_s1 = inlined_call_operand.vmem [shape: bf16[64,16], index: 1, kind: input, shape index: {}]   ;;  %s2115_s2 = inlined_call_operand.vmem [shape: bf16[64,16], index: 2, kind: input, shape index: {}]   ;;  %s2116_s3 = inlined_call_operand.vmem [shape: bf16[16,256], index: 3, kind: input, shape index: {}]   ;;  %s2117_s4 = inlined_call_operand.vmem [shape: f32[1,256], index: 4, kind: input, shape index: {}]   ;;  %s2118_s5 = inlined_call_operand.hbm [shape: f32[64,64], index: 5, kind: output, shape index: {}]  }
   0x1   :  { %12 = vsyncpa [#allocation3 + $0x1], 0  ;;  %s1733_s18 = smov 0   ;;  %s1735_s19 = smov 0  }
   0x2   :  { %s1737_s20 = smov 0   ;;  %s1739_s21 = smov 0  }
   0x3 LB: > { %s1754_s22 = sadd.s32 4294967295, %s1695_s21   ;;  %s1428_s23 = sadd.s32 4294967294, %s1695_s21   ;;  %s1695_s21 = sphi %s1739_s21, %s2124_s21   ;;  %s1691_s20 = sphi %s1737_s20, %s2123_s20   ;;  %s1687_s19 = sphi %s1735_s19, %s2122_s19   ;;  %s1683_s18 = sphi %s1733_s18, %s2121_s18  }
   0x4   : > { %s1758_s24 = sadd.s32 1, %s1695_s21   ;;  %s145_s25 = sadd.s32 1, %s1691_s20 }
   0x5   : > { %s142_s26 = ssub.s32 %s1695_s21, %s1758_s24  ;;  %p155_p0 = scmp.ne.s32.totalorder %s1691_s20, %s1687_s19 }
   0x6   : > { %p143_p1 = scmp.eq.s32.totalorder %s142_s26, 0  ;;  %p156_p2 = scmp.eq.s32.totalorder %s1754_s22, 1 }
   0x7   : > { %p161_p3 = scmp.ne.s32.totalorder %s1687_s19, %s1683_s18  ;;  %p162_p4 = scmp.eq.s32.totalorder %s1428_s23, 1 }
   0x8   : > { %s1769_s27 = scalar_select %p143_p1, %s1691_s20, %s145_s25  }
   0x9   : > { %p1771_p5 = por %p156_p2, %p155_p0  ;;  %p1775_p6 = por %p162_p4, %p161_p3 }
   0xa   : > { %p1431_p7 = scmp.ge.s32.totalorder %s1695_s21, 1  ;;  %p213_p8 = scmp.lt.s32.totalorder %s1695_s21, 3 }
   0xc   : > { %p214_p9 = pnand %p1431_p7, %p213_p8 }
   0xd   : > { %s1433_s9 = sshll.u32 (!%p214_p9), %s1754_s22, 2  ;;  %s1697_s14 = smov (!%p214_p9), 64  }
   0xe   : > { %217 = sbr.rel (%p214_p9) target bundleno = 1401 (0x579), region = 40  ;;  %p252_p10 = scmp.lt.s32.totalorder (!%p214_p9), %s1433_s9, 7 }
   0xf   : > { %s1699_s13 = smov (!%p214_p9), 96   ;;  %s1653_s12 = scalar_lea.hbm (!%p214_p9), %s2118_s5, 64 }
  0x13   : > { %v1463_v0 = vld [vmem:[%s2116_s3 + $0x4] sm:$0xf]  ;;  %v1513_v1 = vld [vmem:[%s2116_s3 + $0x8] sm:$0xf0]  ;;  %v1449_v3 = vld [vmem:[%s2116_s3] sm:$0xf] }
  0x14   : > { %v1464_v2 = vor.u32 %v1513_v1, %v1463_v0  ;;  %v1512_v4 = vld [vmem:[%s2116_s3 + $0x4] sm:$0xf0]  ;;  %s2126_s9 = smov (!%p252_p10, %s1433_s9), 7  ;;  %vm305_vm0 = vcmask 130048   ;;  %v1808_v10 = vld [vmem:[%s2117_s4 + $0x1] ss:$0 sm:$0xff] }
  0x15   : > { %v1450_v5 = vor.u32 %v1512_v4, %v1449_v3  ;;  %s1434_s15 = sshll.u32 %s2126_s9, 2  ;;  %391 = vrot.lane.b32.xlu1 %v1808_v10, %s1697_s14  ;;  %v1698_v13 = vmov 8.0   ;;  %v1822_v15 = vld [vmem:[%s2117_s4] ss:$0 sm:$0xff]  ;;  %vm419_vm1 = vcmask 523264   ;;  %vm446_vm3 = vcmask 261120  }
  0x16   : > { %388 = vrot.lane.b32.xlu0 %v1464_v2, %s1697_s14  ;;  %366 = vmatpush.bf16.msra.mxu1 %v1464_v2  ;;  %s255_s23 = scalar_lea.vmem %s2113_s0, %s1434_s15  ;;  %s261_s30 = scalar_lea.vmem %s2114_s1, %s1434_s15  ;;  %1567 = vrcp.f32 %v1698_v13  ;;  %vm473_vm4 = vcmask 64512   ;;  %vm606_vm5 = vcmask 523520  }
  0x17   : > { %319 = vmatpush.bf16.msra.mxu0 %v1450_v5  ;;  %v1506_v6 = vld [vmem:[%s255_s23] sm:$0xff]  ;;  %v1509_v8 = vld [vmem:[%s261_s30 + $0x8] sm:$0xff]  ;;  %s1815_s10 = scalar_lea.vmem %s2115_s2, %s1434_s15  ;;  %s248_s15 = sand.u32 1, %s1687_s19  }
  0x18   : > { %v1508_v7 = vld [vmem:[%s261_s30] sm:$0xff]  ;;  %v1507_v9 = vld [vmem:[%s255_s23 + $0x8] sm:$0xff]  ;;  %s1432_s16 = sshll.u32 %s248_s15, 5  ;;  %s1700_s23 = smov 32  }
  0x19   : > { %1465 = vmatmul.msk.bf16.vlgmr.msra.gmra.mxu1 %vm305_vm0, %v1508_v7  ;;  %v1510_v12 = vld [vmem:[%s1815_s10] sm:$0xff]  ;;  %s1966_s17 = scalar_lea.vmem [#allocation2], %s1432_s16 }
  0x1a   : > { %1451 = vmatmul.msk.bf16.vlgmr.msra.gmra.mxu0 %vm305_vm0, %v1506_v6  ;;  %s1339_s6 = sshll.u32 %s1966_s17, 4  ;;  %s1340_s6 = int_to_ptr.vmem [resolvable:$true] %s1339_s6 }
  0x1c   : > { %v1568_v14 = vpop.eup %1567 }
  0x1d   : > { %v428_v16 = vmul.f32 8.0, %v1568_v14  ;;  %vm432_vm2 = vweird.f32 %v1568_v14 }
  0x1f   : > { %v429_v21 = vsub.f32 1.0, %v428_v16 }
  0x21   : > { %v430_v26 = vmul.f32 %v1568_v14, %v429_v21 }
  0x23   : > { %v431_v35 = vadd.f32 %v1568_v14, %v430_v26 }
  0x25   : > { %v1838_v44 = vsel %vm432_vm2, %v1568_v14, %v431_v35 }
  0x29   : > { %1466 = vmatmul.msk.bf16.gmra.mxu1 %vm305_vm0, %v1509_v8 }
  0x2a   : > { %1452 = vmatmul.msk.bf16.gmra.mxu0 %vm305_vm0, %v1507_v9 }
  0x88   : > { %v389_v11 = vpop.permute.xlu0 %388 }
  0x89   : > { %407 = vmatpush.bf16.msra.mxu2 %v389_v11 }
  0x8c   : > { %1475 = vmatmul.msk.bf16.vlgmr.msra.gmra.mxu2 %vm305_vm0, %v1510_v12 }
  0x96   : > { %v368_v18 = vpop.f32.mrf.mxu1 }
  0x97   : > { %v321_v17 = vpop.f32.mrf.mxu0  ;;  %v369_v20 = vadd.f32 %v1808_v10, %v368_v18 }
  0x98   : > { %v1825_v19 = vadd.f32 %v1822_v15, %v321_v17 }
  0x99   : > { %v435_v23 = vsel %vm419_vm1, %v369_v20, 0.0 }
  0x9a   : > { %v420_v22 = vsel %vm419_vm1, %v1825_v19, 0.0  ;;  %v436_v25 = vrot.slane %v435_v23, 4 }
  0x9b   : > { %v421_v24 = vrot.slane %v420_v22, 4 }
  0x9c   : > { %v437_v28 = vadd.f32 %v436_v25, %v435_v23 }
  0x9d   : > { %v422_v27 = vadd.f32 %v421_v24, %v420_v22 }
  0x9e   : > { %v438_v30 = vrot.slane %v437_v28, 2  ;;  %v370_v32 = vpop.f32.mrf.mxu1 }
  0x9f   : > { %v423_v29 = vrot.slane %v422_v27, 2  ;;  %v323_v31 = vpop.f32.mrf.mxu0  ;;  %v371_v34 = vadd.f32 %v1808_v10, %v370_v32 }
  0xa0   : > { %v1832_v33 = vadd.f32 %v1822_v15, %v323_v31  ;;  %v439_v36 = vadd.f32 %v438_v30, %v437_v28 }
  0xa1   : > { %v424_v37 = vadd.f32 %v423_v29, %v422_v27  ;;  %v662_v39 = vsel %vm419_vm1, %v371_v34, 0.0 }
  0xa2   : > { %v654_v38 = vsel %vm419_vm1, %v1832_v33, 0.0  ;;  %v663_v41 = vrot.slane %v662_v39, 4  ;;  %v440_v42 = vrot.slane %v439_v36, 1 }
  0xa3   : > { %v655_v40 = vrot.slane %v654_v38, 4  ;;  %v425_v43 = vrot.slane %v424_v37, 1 }
  0xa4   : > { %v664_v46 = vadd.f32 %v663_v41, %v662_v39  ;;  %v441_v47 = vadd.f32 %v440_v42, %v439_v36  ;;  %v1511_v39 = vld [vmem:[%s1815_s10 + $0x8] sm:$0xff] }
  0xa5   : > { %v656_v45 = vadd.f32 %v655_v40, %v654_v38  ;;  %v426_v48 = vadd.f32 %v425_v43, %v424_v37  ;;  %1476 = vmatmul.msk.bf16.gmra.mxu2 %vm305_vm0, %v1511_v39 }
  0xa6   : > { %v665_v50 = vrot.slane %v664_v46, 2  ;;  %v442_v51 = vmul.f32 %v441_v47, %v1838_v44  ;;  %v373_v53 = vpop.f32.mrf.mxu1 }
  0xa7   : > { %v657_v49 = vrot.slane %v656_v45, 2  ;;  %v434_v52 = vmul.f32 %v1838_v44, %v426_v48  ;;  %v1843_v54 = vadd.f32 %v1808_v10, %v373_v53  ;;  %v326_v16 = vpop.f32.mrf.mxu0 }
  0xa8   : > { %v666_v56 = vadd.f32 %v665_v50, %v664_v46  ;;  %v444_v57 = vsub.f32 %v369_v20, %v442_v51  ;;  %v1866_v18 = vadd.f32 %v1822_v15, %v326_v16  ;;  %v1897_v51 = vpop.permute.xlu1 %391 }
  0xa9   : > { %v658_v55 = vadd.f32 %v657_v49, %v656_v45  ;;  %v886_v58 = vsel %vm419_vm1, %v1843_v54, 0.0  ;;  %v1847_v59 = vmul.f32 %v434_v52, %v369_v20  ;;  %v443_v63 = vsub.f32 %v1825_v19, %v434_v52 }
  0xaa   : > { %544 = vrot.lane.b32.xlu2 %v444_v57, %s1699_s13  ;;  %1477 = vmatpush.xpose.msk.msra.mxu3 %vm446_vm3, %v444_v57  ;;  %v667_v60 = vrot.slane %v666_v56, 1  ;;  %v887_v62 = vrot.slane %v886_v58, 4  ;;  %v878_v21 = vsel %vm419_vm1, %v1866_v18, 0.0 }
  0xab   : > { %v659_v61 = vrot.slane %v658_v55, 1  ;;  %v879_v24 = vrot.slane %v878_v21, 4  ;;  %v485_v40 = vsel %vm446_vm3, %v1847_v59, 0.0 }
  0xac   : > { %v668_v0 = vadd.f32 %v667_v60, %v666_v56  ;;  %v888_v2 = vadd.f32 %v887_v62, %v886_v58 }
  0xad   : > { %v660_v1 = vadd.f32 %v659_v61, %v658_v55  ;;  %1478 = vmatmul.msk.f32.vlgmr.msra.gmra.mxu3 %vm446_vm3, %v443_v63  ;;  %v880_v27 = vadd.f32 %v879_v24, %v878_v21 }
  0xae   : > { %v669_v3 = vmul.f32 %v668_v0, %v1838_v44  ;;  %v889_v5 = vrot.slane %v888_v2, 2  ;;  %v375_v6 = vpop.f32.mrf.mxu1 }
  0xaf   : > { %v661_v4 = vmul.f32 %v660_v1, %v1838_v44  ;;  %v1856_v7 = vadd.f32 %v1808_v10, %v375_v6  ;;  %v881_v29 = vrot.slane %v880_v27, 2  ;;  %v328_v41 = vpop.f32.mrf.mxu0 }
  0xb0   : > { %v671_v8 = vsub.f32 %v371_v34, %v669_v3  ;;  %v890_v9 = vadd.f32 %v889_v5, %v888_v2  ;;  %v1893_v42 = vadd.f32 %v1822_v15, %v328_v41 }
  0xb1   : > { %v1858_v11 = vmul.f32 %v661_v4, %v371_v34  ;;  %v1110_v12 = vsel %vm419_vm1, %v1856_v7, 0.0  ;;  %v670_v17 = vsub.f32 %v1832_v33, %v661_v4  ;;  %v882_v31 = vadd.f32 %v881_v29, %v880_v27 }
  0xb2   : > { %1483 = vmatpush.xpose.msk.msrb.mxu0 %vm446_vm3, %v671_v8  ;;  %542 = vrot.lane.b32.xlu2 %v443_v63, %s1699_s13  ;;  %v1111_v13 = vrot.slane %v1110_v12, 4  ;;  %v891_v14 = vrot.slane %v890_v9, 1  ;;  %v1102_v43 = vsel %vm419_vm1, %v1893_v42, 0.0 }
  0xb3   : > { %v883_v34 = vrot.slane %v882_v31, 1  ;;  %v1103_v45 = vrot.slane %v1102_v43, 4 }
  0xb4   : > { %v1112_v10 = vadd.f32 %v1111_v13, %v1110_v12  ;;  %v892_v20 = vadd.f32 %v891_v14, %v890_v9 }
  0xb5   : > { %1484 = vmatmul.msk.f32.vlgmr.msrb.gmra.mxu0 %vm446_vm3, %v670_v17  ;;  %v884_v36 = vadd.f32 %v883_v34, %v882_v31  ;;  %v1104_v46 = vadd.f32 %v1103_v45, %v1102_v43 }
  0xb6   : > { %v1113_v22 = vrot.slane %v1112_v10, 2  ;;  %v893_v23 = vmul.f32 %v892_v20, %v1838_v44 }
  0xb7   : > { %v1879_v37 = vmul.f32 %v884_v36, %v1838_v44  ;;  %v1105_v48 = vrot.slane %v1104_v46, 2 }
  0xb8   : > { %v1114_v25 = vadd.f32 %v1113_v22, %v1112_v10  ;;  %v895_v26 = vsub.f32 %v1843_v54, %v893_v23 }
  0xb9   : > { %v894_v38 = vsub.f32 %v1866_v18, %v1879_v37  ;;  %v1106_v49 = vadd.f32 %v1105_v48, %v1104_v46 }
  0xba   : > { %769 = vrot.lane.b32.xlu2 %v671_v8, %s1699_s13  ;;  %v1115_v28 = vrot.slane %v1114_v25, 1  ;;  %1489 = vmatpush.xpose.msk.msra.mxu0 %vm446_vm3, %v895_v26 }
  0xbb   : > { %991 = vrot.lane.b32.xlu1 %v894_v38, %s1699_s13  ;;  %v1107_v50 = vrot.slane %v1106_v49, 1 }
  0xbc   : > { %v1116_v30 = vadd.f32 %v1115_v28, %v1114_v25 }
  0xbd   : > { %1490 = vmatmul.msk.f32.vlgmr.msra.gmra.mxu0 %vm446_vm3, %v894_v38  ;;  %v1108_v52 = vadd.f32 %v1107_v50, %v1106_v49 }
  0xbe   : > { %v1117_v32 = vmul.f32 %v1116_v30, %v1838_v44 }
  0xbf   : > { %v1903_v15 = vmul.f32 %v1108_v52, %v1838_v44 }
  0xc0   : > { %v1119_v35 = vsub.f32 %v1856_v7, %v1117_v32 }
  0xc1   : > { %v1118_v57 = vsub.f32 %v1893_v42, %v1903_v15 }
  0xc2   : > { %767 = vrot.lane.b32.xlu2 %v670_v17, %s1699_s13  ;;  %1495 = vmatpush.xpose.msk.msrb.mxu0 %vm446_vm3, %v1119_v35 }
  0xc5   : > { %1496 = vmatmul.msk.f32.vlgmr.msrb.gmra.mxu0 %vm446_vm3, %v1118_v57 }
  0xca   : > { %993 = vrot.lane.b32.xlu2 %v895_v26, %s1699_s13 }
  0xd2   : > { %1217 = vrot.lane.b32.xlu2 %v1119_v35, %s1699_s13 }
  0xfb   : > { %486 = vadd.xlane.f32.xlu2 %v485_v40 }
 0x104   : > { %v545_v47 = vpop.permute.xlu2 %544 }
 0x10c   : > { %v543_v55 = vpop.permute.xlu2 %542 }
 0x10f   : > { %v409_v53 = vpop.f32.mrf.mxu2 }
 0x110   : > { %v1900_v56 = vadd.f32 %v409_v53, %v1897_v51 }
 0x112   : > { %531 = vmatpush.msrb.mxu3 %v1900_v56 }
 0x114   : > { %1480 = vmatpush.xpose.msk.msra.mxu3 %vm446_vm3, %v545_v47  ;;  %v770_v58 = vpop.permute.xlu2 %769 }
 0x115   : > { %1486 = vmatpush.xpose.msk.msrb.mxu2 %vm446_vm3, %v770_v58 }
 0x117   : > { %v411_v5 = vpop.f32.mrf.mxu2 }
 0x118   : > { %v1925_v6 = vadd.f32 %v411_v5, %v1897_v51 }
 0x11a   : > { %756 = vmatpush.msrb.mxu1 %v1925_v6 }
 0x11c   : > { %v768_v60 = vpop.permute.xlu2 %767 }
 0x11d   : > { %1487 = vmatmul.msk.f32.vlgmr.msrb.gmra.mxu2 %vm446_vm3, %v768_v60  ;;  %v1957_v60 = vmul.f32 %v1879_v37, %v1843_v54 }
 0x124   : > { %v994_v61 = vpop.permute.xlu2 %993 }
 0x125   : > { %1492 = vmatpush.xpose.msk.msra.mxu2 %vm446_vm3, %v994_v61 }
 0x128   : > { %v414_v8 = vpop.f32.mrf.mxu2 }
 0x129   : > { %v1929_v9 = vadd.f32 %v414_v8, %v1897_v51 }
 0x12b   : > { %980 = vmatpush.msra.mxu1 %v1929_v9 }
 0x12c   : > { %v1218_v44 = vpop.permute.xlu2 %1217 }
 0x12d   : > { %1498 = vmatpush.xpose.msk.msrb.mxu2 %vm446_vm3, %v1218_v44  ;;  %v992_v2 = vpop.permute.xlu1 %991 }
 0x12e   : > { %1493 = vmatmul.msk.f32.vlgmr.msra.gmra.mxu2 %vm446_vm3, %v992_v2 }
 0x130   : > { %v470_v62 = vpop.f32.mrf.mxu3  ;;  %v1932_v12 = vpop.f32.mrf.mxu2 }
 0x131   : > { %v474_v63 = vsel %vm473_vm4, %v470_v62, -inf }
 0x132   : > { %v1915_v0 = vpop.f32.mrf.mxu0  ;;  %475 = vmax.xlane.f32.xlu0 %v474_v63 }
 0x133   : > { %v699_v1 = vsel %vm473_vm4, %v1915_v0, -inf }
 0x134   : > { %700 = vmax.xlane.f32.xlu2 %v699_v1 }
 0x13a   : > { %v1920_v3 = vpop.f32.mrf.mxu0 }
 0x13b   : > { %v923_v4 = vsel %vm473_vm4, %v1920_v3, -inf }
 0x13c   : > { %924 = vmax.xlane.f32.xlu2 %v923_v4 }
 0x16e   : > { %v487_v32 = vpop.xlane.xlu2 %486 }
 0x16f   : > { %v488_v34 = vrot.slane %v487_v32, 4 }
 0x171   : > { %v489_v36 = vmax.f32 %v487_v32, %v488_v34 }
 0x173   : > { %v490_v38 = vrot.slane %v489_v36, 2 }
 0x175   : > { %v491_v40 = vmax.f32 %v489_v36, %v490_v38 }
 0x177   : > { %v492_v45 = vrot.slane %v491_v40, 1 }
 0x179   : > { %v493_v46 = vmax.f32 %v491_v40, %v492_v45 }
 0x17b   : > { %v494_v49 = vsub.f32 %v487_v32, %v493_v46 }
 0x17d   : > { %v495_v50 = vmul.f32 1.442695, %v494_v49 }
 0x1a0   : > { %v792_v13 = vpop.f32.mrf.mxu2 }
 0x1a1   : > { %v795_v14 = vsel %vm473_vm4, %v792_v13, -inf }
 0x1a2   : > { %796 = vmax.xlane.f32.xlu0 %v795_v14 }
 0x1a5   : > { %v476_v16 = vpop.xlane.xlu0 %475 }
 0x1a6   : > { %v477_v17 = vsub.f32 %v470_v62, %v476_v16 }
 0x1a8   : > { %v478_v10 = vmul.f32 1.442695, %v477_v17 }
 0x1aa   : > { %1569 = vpow2.f32 %v478_v10 }
 0x1b0   : > { %v1570_v20 = vpop.eup %1569 }
 0x1b1   : > { %v480_v21 = vsel %vm473_vm4, %v1570_v20, 0.0  ;;  %v1016_v22 = vpop.f32.mrf.mxu2 }
 0x1b2   : > { %481 = vadd.xlane.f32.xlu1 %v480_v21  ;;  %v1019_v23 = vsel %vm473_vm4, %v1016_v22, -inf }
 0x1b6   : > { %537 = vrot.lane.b32.xlu0 %v1825_v19, %s1697_s14 }
 0x1cb   : > { %1215 = vrot.lane.b32.xlu1 %v1118_v57, %s1699_s13 }
 0x1d3   : > { %582 = vrot.lane.b32.xlu1 %v1847_v59, %s1699_s13 }
 0x1e0   : > { %1020 = vmax.xlane.f32.xlu0 %v1019_v23  ;;  %v1560_v23 = vpack.i.bf16 %v1925_v6, %v1900_v56 }
 0x215   : > { %v797_v24 = vpop.xlane.xlu0 %796 }
 0x216   : > { %v798_v25 = vsub.f32 %v792_v13, %v797_v24  ;;  %v701_v24 = vpop.xlane.xlu2 %700 }
 0x218   : > { %v799_v26 = vmul.f32 1.442695, %v798_v25 }
 0x21a   : > { %1571 = vpow2.f32 %v799_v26 }
 0x21e   : > { %v925_v25 = vpop.xlane.xlu2 %924 }
 0x21f   : > { %v926_v26 = vsub.f32 %v1920_v3, %v925_v25 }
 0x220   : > { %v1942_v27 = vpop.eup %1571 }
 0x221   : > { %v801_v28 = vsel %vm473_vm4, %v1942_v27, 0.0 }
 0x222   : > { %802 = vadd.xlane.f32.xlu2 %v801_v28  ;;  %v927_v28 = vmul.f32 1.442695, %v926_v26 }
 0x225   : > { %v482_v29 = vpop.xlane.xlu1 %481 }
 0x226   : > { %1573 = vrcp.f32 %v482_v29  ;;  %v1976_v29 = vpop.f32.mrf.mxu0 }
 0x228   : > { %v538_v35 = vpop.permute.xlu0 %537 }
 0x22c   : > { %v1574_v30 = vpop.eup %1573 }
 0x22d   : > { %v484_v31 = vmul.f32 %v1574_v30, %v1570_v20  ;;  %v1147_v30 = vsel %vm473_vm4, %v1976_v29, -inf }
 0x22f   : > { %1479 = vmatmul.msk.f32.vlgmr.msrb.gmra.mxu3 %vm473_vm4, %v484_v31 }
 0x237   : > { %1481 = vmatmul.msk.f32.vlgmr.msra.gmra.mxu3 %vm446_vm3, %v543_v55 }
 0x23d   : > { %v1216_v59 = vpop.permute.xlu1 %1215 }
 0x23e   : > { %1499 = vmatmul.msk.f32.vlgmr.msrb.gmra.mxu2 %vm446_vm3, %v1216_v59 }
 0x245   : > { %v583_v32 = vpop.permute.xlu1 %582 }
 0x253   : > { %v1021_v39 = vpop.xlane.xlu0 %1020 }
 0x254   : > { %v1022_v41 = vsub.f32 %v1016_v22, %v1021_v39 }
 0x256   : > { %v1023_v43 = vmul.f32 1.442695, %v1022_v41 }
 0x258   : > { %1575 = vpow2.f32 %v1023_v43 }
 0x259   : > { %1577 = vpow2.f32 %v495_v50  ;;  %v1988_v50 = vadd.f32 %v1932_v12, %v1897_v51  ;;  %v934_v51 = vsel %vm446_vm3, %v1957_v60, 0.0 }
 0x25e   : > { %v1949_v47 = vpop.eup %1575 }
 0x25f   : > { %v1025_v48 = vsel %vm473_vm4, %v1949_v47, 0.0  ;;  %v1578_v52 = vpop.eup %1577 }
 0x260   : > { %1026 = vadd.xlane.f32.xlu2 %v1025_v48  ;;  %v497_v53 = vrot.slane %v1578_v52, 4 }
 0x262   : > { %v498_v55 = vadd.f32 %v1578_v52, %v497_v53  ;;  %v702_v53 = vsub.f32 %v1915_v0, %v701_v24 }
 0x264   : > { %v499_v57 = vrot.slane %v498_v55, 2 }
 0x266   : > { %v500_v58 = vadd.f32 %v499_v57, %v498_v55  ;;  %v703_v55 = vmul.f32 1.442695, %v702_v53  ;;  %v585_v57 = vsel %vm446_vm3, %v583_v32, 0.0 }
 0x268   : > { %v501_v61 = vrot.slane %v500_v58, 1 }
 0x26a   : > { %v502_v44 = vadd.f32 %v501_v61, %v500_v58 }
 0x26c   : > { %1579 = vrcp.f32 %v502_v44 }
 0x26d   : > { %1581 = vpow2.f32 %v927_v28 }
 0x272   : > { %v1580_v62 = vpop.eup %1579 }
 0x273   : > { %v504_v63 = vmul.f32 %v1580_v62, %v1578_v52  ;;  %v1980_v31 = vpop.eup %1581  ;;  %v1996_v52 = vmul.f32 %v1903_v15, %v1856_v7 }
 0x274   : > { %v929_v59 = vsel %vm473_vm4, %v1980_v31, 0.0 }
 0x275   : > { %v505_v1 = vmul.f32 %v504_v63, %v1900_v56 }
 0x277   : > { %v506_v2 = vsel %vm446_vm3, %v505_v1, 0.0 }
 0x278   : > { %1063 = vrot.lane.b32.xlu2 %v1929_v9, %s1699_s13  ;;  %v507_v4 = vrot.slane %v506_v2, 4 }
 0x27a   : > { %v508_v5 = vadd.f32 %v507_v4, %v506_v2 }
 0x27c   : > { %v509_v8 = vrot.slane %v508_v5, 2 }
 0x27e   : > { %v510_v13 = vadd.f32 %v509_v8, %v508_v5 }
 0x280   : > { %1031 = vrot.lane.b32.xlu2 %v1957_v60, %s1699_s13  ;;  %v511_v14 = vrot.slane %v510_v13, 1 }
 0x282   : > { %v512_v54 = vadd.f32 %v511_v14, %v510_v13 }
 0x295   : > { %v803_v7 = vpop.xlane.xlu2 %802 }
 0x2b2   : > { %v533_v37 = vpop.f32.mrf.mxu3 }
 0x2b3   : > { %v534_v16 = vadd.f32 %v533_v37, %v512_v54 }
 0x2b5   : > { %v540_v17 = vadd.f32 %v538_v35, %v534_v16 }
 0x2b7   : > { %541 = vst.msk [vmem:[%s1966_s17] sm:$0xff] %vm446_vm3, %v540_v17 }
 0x2ba   : > { %v567_v10 = vpop.f32.mrf.mxu3 }
 0x2bb   : > { %v570_v20 = vsel %vm473_vm4, %v567_v10, -inf }
 0x2bc   : > { %571 = vmax.xlane.f32.xlu1 %v570_v20 }
 0x2c1   : > { %v1240_v21 = vpop.f32.mrf.mxu2 }
 0x2c2   : > { %v1243_v22 = vsel %vm473_vm4, %v1240_v21, -inf }
 0x2c3   : > { %1244 = vmax.xlane.f32.xlu0 %v1243_v22 }
 0x2d3   : > { %v1027_v15 = vpop.xlane.xlu2 %1026 }
 0x2d5   : > { %1561 = vrot.lane.b32.xlu1 %v1560_v23, %s1699_s13 }
 0x2db   : > { %v1064_v61 = vpop.permute.xlu2 %1063 }
 0x2e3   : > { %v1032_v44 = vpop.permute.xlu2 %1031 }
 0x2e4   : > { %v1034_v17 = vsel %vm446_vm3, %v1032_v44, 0.0 }
 0x2ff   : > { %1148 = vmax.xlane.f32.xlu1 %v1147_v30 }
 0x307   : > { %930 = vadd.xlane.f32.xlu1 %v929_v59 }
 0x32f   : > { %v572_v34 = vpop.xlane.xlu1 %571 }
 0x330   : > { %v573_v35 = vsub.f32 %v567_v10, %v572_v34 }
 0x332   : > { %v574_v36 = vmul.f32 1.442695, %v573_v35 }
 0x334   : > { %1583 = vpow2.f32 %v574_v36 }
 0x336   : > { %v1245_v3 = vpop.xlane.xlu0 %1244 }
 0x337   : > { %v1246_v38 = vsub.f32 %v1240_v21, %v1245_v3 }
 0x339   : > { %v1247_v39 = vmul.f32 1.442695, %v1246_v38 }
 0x33a   : > { %v1584_v40 = vpop.eup %1583 }
 0x33b   : > { %1585 = vpow2.f32 %v1247_v39  ;;  %v576_v41 = vsel %vm473_vm4, %v1584_v40, 0.0 }
 0x33c   : > { %577 = vadd.xlane.f32.xlu2 %v576_v41  ;;  %1587 = vpow2.f32 %v703_v55 }
 0x341   : > { %v1586_v43 = vpop.eup %1585 }
 0x342   : > { %v1249_v45 = vsel %vm473_vm4, %v1586_v43, 0.0  ;;  %v1588_v12 = vpop.eup %1587 }
 0x343   : > { %1250 = vadd.xlane.f32.xlu0 %v1249_v45  ;;  %v705_v58 = vsel %vm473_vm4, %v1588_v12, 0.0 }
 0x347   : > { %v1562_v46 = vpop.permute.xlu1 %1561 }
 0x348   : > { %v1564_v48 = vunpack.i.h.bf16 %v1562_v46  ;;  %v1563_v49 = vunpack.i.l.bf16 %v1562_v46 }
 0x34a   : > { %640 = vmatpush.msrb.mxu3 %v1563_v49 }
 0x34c   : > { %864 = vmatpush.msra.mxu3 %v1564_v48 }
 0x354   : > { %1287 = vrot.lane.b32.xlu2 %v1988_v50, %s1699_s13 }
 0x357   : > { %807 = vrot.lane.b32.xlu0 %v1858_v11, %s1699_s13 }
 0x35f   : > { %1255 = vrot.lane.b32.xlu0 %v1996_v52, %s1699_s13 }
 0x372   : > { %v1149_v37 = vpop.xlane.xlu1 %1148 }
 0x37a   : > { %v931_v35 = vpop.xlane.xlu1 %930 }
 0x37d   : > { %586 = vadd.xlane.f32.xlu2 %v585_v57 }
 0x385   : > { %935 = vadd.xlane.f32.xlu2 %v934_v51 }
 0x389   : > { %706 = vadd.xlane.f32.xlu0 %v705_v58 }
 0x3af   : > { %v578_v62 = vpop.xlane.xlu2 %577 }
 0x3b0   : > { %1589 = vrcp.f32 %v578_v62 }
 0x3b1   : > { %1591 = vrcp.f32 %v803_v7 }
 0x3b2   : > { %1593 = vrcp.f32 %v1027_v15 }
 0x3b6   : > { %v1590_v0 = vpop.eup %1589  ;;  %v1251_v2 = vpop.xlane.xlu0 %1250 }
 0x3b7   : > { %v580_v63 = vmul.f32 %v1590_v0, %v1584_v40  ;;  %v1592_v1 = vpop.eup %1591  ;;  %v1288_v4 = vpop.permute.xlu2 %1287  ;;  %1595 = vrcp.f32 %v1251_v2 }
 0x3b8   : > { %v805_v60 = vmul.f32 %v1592_v1, %v1942_v27  ;;  %v1594_v5 = vpop.eup %1593  ;;  %v1150_v27 = vsub.f32 %v1976_v29, %v1149_v37 }
 0x3b9   : > { %1482 = vmatmul.msk.f32.vlgmr.msrb.gmra.mxu3 %vm473_vm4, %v580_v63  ;;  %v1029_v8 = vmul.f32 %v1594_v5, %v1949_v47 }
 0x3ba   : > { %1088 = vmatpush.msrb.mxu3 %v1064_v61  ;;  %v1151_v10 = vmul.f32 1.442695, %v1150_v27  ;;  %v1158_v61 = vsel %vm446_vm3, %v1996_v52, 0.0 }
 0x3bc   : > { %1597 = vpow2.f32 %v1151_v10 }
 0x3bd   : > { %v1596_v54 = vpop.eup %1595 }
 0x3be   : > { %v1253_v16 = vmul.f32 %v1596_v54, %v1586_v43 }
 0x3c1   : > { %1488 = vmatmul.msk.f32.vlgmr.msra.gmra.mxu3 %vm473_vm4, %v805_v60 }
 0x3c2   : > { %1312 = vmatpush.msra.mxu3 %v1288_v4  ;;  %v2015_v21 = vpop.eup %1597 }
 0x3c3   : > { %v1153_v22 = vsel %vm473_vm4, %v2015_v21, 0.0 }
 0x3c9   : > { %1494 = vmatmul.msk.f32.vlgmr.msrb.gmra.mxu3 %vm473_vm4, %v1029_v8  ;;  %v808_v13 = vpop.permute.xlu0 %807 }
 0x3ca   : > { %v810_v14 = vsel %vm446_vm3, %v808_v13, 0.0 }
 0x3cb   : > { %811 = vadd.xlane.f32.xlu1 %v810_v14 }
 0x3d1   : > { %1500 = vmatmul.msk.f32.vlgmr.msra.gmra.mxu3 %vm473_vm4, %v1253_v16  ;;  %v1256_v20 = vpop.permute.xlu0 %1255 }
 0x3d2   : > { %v1258_v47 = vsel %vm446_vm3, %v1256_v20, 0.0 }
 0x3d3   : > { %1035 = vadd.xlane.f32.xlu1 %v1034_v17 }
 0x3db   : > { %1259 = vadd.xlane.f32.xlu1 %v1258_v47 }
 0x3e3   : > { %1154 = vadd.xlane.f32.xlu1 %v1153_v22 }
 0x3f0   : > { %v587_v23 = vpop.xlane.xlu2 %586 }
 0x3f1   : > { %v588_v24 = vrot.slane %v587_v23, 4 }
 0x3f3   : > { %v589_v25 = vmax.f32 %v587_v23, %v588_v24  ;;  %v710_v24 = vsel %vm446_vm3, %v1858_v11, 0.0 }
 0x3f5   : > { %v590_v26 = vrot.slane %v589_v25, 2 }
 0x3f7   : > { %v591_v28 = vmax.f32 %v589_v25, %v590_v26 }
 0x3f9   : > { %v592_v29 = vrot.slane %v591_v28, 1 }
 0x3fb   : > { %v593_v30 = vmax.f32 %v591_v28, %v592_v29 }
 0x3fc   : > { %645 = vrot.lane.b32.xlu1 %v1825_v19, %s1700_s23  ;;  %v707_v59 = vpop.xlane.xlu0 %706 }
 0x3fd   : > { %v594_v32 = vsub.f32 %v587_v23, %v593_v30  ;;  %1599 = vrcp.f32 %v707_v59 }
 0x3ff   : > { %v595_v34 = vmul.f32 1.442695, %v594_v32 }
 0x401   : > { %1601 = vpow2.f32 %v595_v34 }
 0x402   : > { %1603 = vrcp.f32 %v931_v35 }
 0x403   : > { %v1600_v36 = vpop.eup %1599 }
 0x404   : > { %762 = vrot.lane.b32.xlu1 %v1832_v33, %s1697_s14  ;;  %v709_v3 = vmul.f32 %v1600_v36, %v1588_v12 }
 0x406   : > { %1485 = vmatmul.msk.f32.vlgmr.msrb.gmra.mxu1 %vm473_vm4, %v709_v3 }
 0x407   : > { %v1602_v38 = vpop.eup %1601  ;;  %1204 = vmatpush.msrb.mxu1 %v1988_v50 }
 0x408   : > { %v597_v39 = vrot.slane %v1602_v38, 4  ;;  %v1604_v40 = vpop.eup %1603 }
 0x409   : > { %v933_v41 = vmul.f32 %v1604_v40, %v1980_v31 }
 0x40a   : > { %v598_v19 = vadd.f32 %v1602_v38, %v597_v39 }
 0x40c   : > { %v599_v43 = vrot.slane %v598_v19, 2 }
 0x40e   : > { %v600_v45 = vadd.f32 %v599_v43, %v598_v19  ;;  %1491 = vmatmul.msk.f32.vlgmr.msra.gmra.mxu1 %vm473_vm4, %v933_v41 }
 0x410   : > { %v601_v46 = vrot.slane %v600_v45, 1 }
 0x412   : > { %v602_v48 = vadd.f32 %v601_v46, %v600_v45 }
 0x414   : > { %1605 = vrcp.f32 %v602_v48 }
 0x41a   : > { %v1606_v49 = vpop.eup %1605 }
 0x41b   : > { %v604_v53 = vmul.f32 %v1606_v49, %v1602_v38 }
 0x41d   : > { %v605_v55 = vmul.f32 %v604_v53, %v1900_v56 }
 0x41f   : > { %v607_v57 = vsel %vm606_vm5, %v605_v55, 0.0 }
 0x420   : > { %v608_v51 = vrot.slane %v607_v57, 4 }
 0x422   : > { %v609_v12 = vadd.f32 %v608_v51, %v607_v57 }
 0x424   : > { %v610_v58 = vrot.slane %v609_v12, 2 }
 0x426   : > { %v611_v7 = vadd.f32 %v610_v58, %v609_v12 }
 0x428   : > { %v612_v15 = vrot.slane %v611_v7, 1 }
 0x42a   : > { %v613_v31 = vadd.f32 %v612_v15, %v611_v7 }
 0x42c   : > { %619 = vrot.lane.b32.xlu0 %v613_v31, %s1699_s13 }
 0x42e   : > { %1159 = vadd.xlane.f32.xlu1 %v1158_v61 }
 0x43e   : > { %v812_v44 = vpop.xlane.xlu1 %811 }
 0x43f   : > { %v813_v62 = vrot.slane %v812_v44, 4 }
 0x441   : > { %v814_v0 = vmax.f32 %v812_v44, %v813_v62 }
 0x443   : > { %v815_v63 = vrot.slane %v814_v0, 2 }
 0x445   : > { %v816_v1 = vmax.f32 %v814_v0, %v815_v63 }
 0x446   : > { %v1036_v56 = vpop.xlane.xlu1 %1035 }
 0x447   : > { %v817_v60 = vrot.slane %v816_v1, 1  ;;  %v1037_v2 = vrot.slane %v1036_v56, 4 }
 0x449   : > { %v818_v4 = vmax.f32 %v816_v1, %v817_v60  ;;  %v1038_v5 = vmax.f32 %v1036_v56, %v1037_v2 }
 0x44b   : > { %v819_v8 = vsub.f32 %v812_v44, %v818_v4  ;;  %v1039_v13 = vrot.slane %v1038_v5, 2 }
 0x44d   : > { %v820_v14 = vmul.f32 1.442695, %v819_v8  ;;  %v1040_v54 = vmax.f32 %v1038_v5, %v1039_v13 }
 0x44e   : > { %v1260_v37 = vpop.xlane.xlu1 %1259 }
 0x44f   : > { %1607 = vpow2.f32 %v820_v14  ;;  %v1041_v16 = vrot.slane %v1040_v54, 1  ;;  %v1261_v27 = vrot.slane %v1260_v37, 4 }
 0x451   : > { %v1042_v52 = vmax.f32 %v1040_v54, %v1041_v16  ;;  %v1262_v17 = vmax.f32 %v1260_v37, %v1261_v27 }
 0x453   : > { %v1043_v10 = vsub.f32 %v1036_v56, %v1042_v52  ;;  %v1263_v20 = vrot.slane %v1262_v17, 2 }
 0x455   : > { %v1608_v47 = vpop.eup %1607  ;;  %v1044_v22 = vmul.f32 1.442695, %v1043_v10  ;;  %v1264_v23 = vmax.f32 %v1262_v17, %v1263_v20 }
 0x456   : > { %v822_v25 = vrot.slane %v1608_v47, 4  ;;  %711 = vadd.xlane.f32.xlu0 %v710_v24  ;;  %v1155_v26 = vpop.xlane.xlu1 %1154  ;;  %v936_v24 = vpop.xlane.xlu2 %935 }
 0x457   : > { %1609 = vpow2.f32 %v1044_v22  ;;  %v1265_v28 = vrot.slane %v1264_v23, 1 }
 0x458   : > { %v823_v29 = vadd.f32 %v1608_v47, %v822_v25  ;;  %1611 = vrcp.f32 %v1155_v26  ;;  %v937_v25 = vrot.slane %v936_v24, 4  ;;  %v642_v26 = vpop.f32.mrf.mxu3 }
 0x459   : > { %v1266_v30 = vmax.f32 %v1264_v23, %v1265_v28 }
 0x45a   : > { %v824_v59 = vrot.slane %v823_v29, 2 }
 0x45b   : > { %v1267_v32 = vsub.f32 %v1260_v37, %v1266_v30 }
 0x45c   : > { %v825_v34 = vadd.f32 %v824_v59, %v823_v29 }
 0x45d   : > { %v1610_v35 = vpop.eup %1609  ;;  %v1268_v36 = vmul.f32 1.442695, %v1267_v32 }
 0x45e   : > { %v1612_v3 = vpop.eup %1611  ;;  %v1046_v38 = vrot.slane %v1610_v35, 4  ;;  %v826_v39 = vrot.slane %v825_v34, 1 }
 0x45f   : > { %1613 = vpow2.f32 %v1268_v36  ;;  %v1157_v40 = vmul.f32 %v1612_v3, %v2015_v21 }
 0x460   : > { %v1047_v11 = vadd.f32 %v1610_v35, %v1046_v38  ;;  %v827_v19 = vadd.f32 %v826_v39, %v825_v34 }
 0x461   : > { %1497 = vmatmul.msk.f32.vlgmr.msrb.gmra.mxu1 %vm473_vm4, %v1157_v40 }
 0x462   : > { %v1048_v41 = vrot.slane %v1047_v11, 2  ;;  %1615 = vrcp.f32 %v827_v19 }
 0x464   : > { %v1049_v43 = vadd.f32 %v1048_v41, %v1047_v11 }
 0x465   : > { %v1614_v45 = vpop.eup %1613 }
 0x466   : > { %v1270_v46 = vrot.slane %v1614_v45, 4  ;;  %v1050_v48 = vrot.slane %v1049_v43, 1 }
 0x468   : > { %v1616_v49 = vpop.eup %1615  ;;  %v1271_v53 = vadd.f32 %v1614_v45, %v1270_v46  ;;  %v1051_v55 = vadd.f32 %v1050_v48, %v1049_v43 }
 0x469   : > { %v829_v57 = vmul.f32 %v1616_v49, %v1608_v47 }
 0x46a   : > { %v1272_v51 = vrot.slane %v1271_v53, 2  ;;  %1617 = vrcp.f32 %v1051_v55 }
 0x46b   : > { %v830_v12 = vmul.f32 %v829_v57, %v1925_v6 }
 0x46c   : > { %v1273_v58 = vadd.f32 %v1272_v51, %v1271_v53 }
 0x46d   : > { %v831_v21 = vsel %vm606_vm5, %v830_v12, 0.0 }
 0x46e   : > { %v832_v7 = vrot.slane %v831_v21, 4  ;;  %v1274_v15 = vrot.slane %v1273_v58, 1  ;;  %v646_v59 = vpop.permute.xlu1 %645 }
 0x470   : > { %v1618_v31 = vpop.eup %1617  ;;  %v833_v61 = vadd.f32 %v832_v7, %v831_v21  ;;  %v1275_v44 = vadd.f32 %v1274_v15, %v1273_v58 }
 0x471   : > { %v1053_v62 = vmul.f32 %v1618_v31, %v1610_v35 }
 0x472   : > { %v834_v0 = vrot.slane %v833_v61, 2  ;;  %1619 = vrcp.f32 %v1275_v44 }
 0x473   : > { %v1054_v63 = vmul.f32 %v1053_v62, %v1929_v9 }
 0x474   : > { %v835_v1 = vadd.f32 %v834_v0, %v833_v61  ;;  %v866_v0 = vpop.f32.mrf.mxu3 }
 0x475   : > { %v1055_v56 = vsel %vm606_vm5, %v1054_v63, 0.0 }
 0x476   : > { %v836_v60 = vrot.slane %v835_v1, 1  ;;  %v1056_v2 = vrot.slane %v1055_v56, 4 }
 0x478   : > { %v1620_v4 = vpop.eup %1619  ;;  %v837_v5 = vadd.f32 %v836_v60, %v835_v1  ;;  %v1057_v8 = vadd.f32 %v1056_v2, %v1055_v56 }
 0x479   : > { %v1277_v13 = vmul.f32 %v1620_v4, %v1614_v45  ;;  %v763_v4 = vpop.permute.xlu1 %762 }
 0x47a   : > { %843 = vrot.lane.b32.xlu0 %v837_v5, %s1699_s13  ;;  %v1058_v14 = vrot.slane %v1057_v8, 2 }
 0x47b   : > { %v1278_v54 = vmul.f32 %v1277_v13, %v1988_v50 }
 0x47c   : > { %v1059_v37 = vadd.f32 %v1058_v14, %v1057_v8  ;;  %v1090_v8 = vpop.f32.mrf.mxu3 }
 0x47d   : > { %v1279_v16 = vsel %vm606_vm5, %v1278_v54, 0.0 }
 0x47e   : > { %v1060_v27 = vrot.slane %v1059_v37, 1  ;;  %v1280_v52 = vrot.slane %v1279_v16, 4 }
 0x480   : > { %v1061_v17 = vadd.f32 %v1060_v27, %v1059_v37  ;;  %v1281_v10 = vadd.f32 %v1280_v52, %v1279_v16 }
 0x482   : > { %869 = vrot.lane.b32.xlu0 %v1832_v33, %s1700_s23  ;;  %1067 = vrot.lane.b32.xlu2 %v1061_v17, %s1699_s13  ;;  %v1282_v20 = vrot.slane %v1281_v10, 2  ;;  %v938_v33 = vmax.f32 %v936_v24, %v937_v25 }
 0x484   : > { %v1283_v47 = vadd.f32 %v1282_v20, %v1281_v10  ;;  %v939_v30 = vrot.slane %v938_v33, 2  ;;  %v758_v20 = vpop.f32.mrf.mxu1 }
 0x486   : > { %v1284_v22 = vrot.slane %v1283_v47, 1  ;;  %v940_v34 = vmax.f32 %v938_v33, %v939_v30  ;;  %v1314_v33 = vpop.f32.mrf.mxu3 }
 0x488   : > { %v1285_v23 = vadd.f32 %v1284_v22, %v1283_v47  ;;  %v941_v35 = vrot.slane %v940_v34, 1 }
 0x48a   : > { %1093 = vrot.lane.b32.xlu0 %v1866_v18, %s1700_s23  ;;  %1317 = vrot.lane.b32.xlu2 %v1893_v42, %s1700_s23  ;;  %v942_v36 = vmax.f32 %v940_v34, %v941_v35 }
 0x48b   : > { %1291 = vrot.lane.b32.xlu1 %v1285_v23, %s1699_s13 }
 0x48c   : > { %v943_v3 = vsub.f32 %v936_v24, %v942_v36  ;;  %v982_v36 = vpop.f32.mrf.mxu1 }
 0x48e   : > { %v944_v38 = vmul.f32 1.442695, %v943_v3 }
 0x490   : > { %1621 = vpow2.f32 %v944_v38 }
 0x493   : > { %986 = vrot.lane.b32.xlu1 %v1866_v18, %s1697_s14 }
 0x496   : > { %v1622_v39 = vpop.eup %1621 }
 0x497   : > { %v946_v40 = vrot.slane %v1622_v39, 4 }
 0x499   : > { %v947_v18 = vadd.f32 %v1622_v39, %v946_v40 }
 0x49b   : > { %v948_v11 = vrot.slane %v947_v18, 2 }
 0x49d   : > { %v949_v45 = vadd.f32 %v948_v11, %v947_v18 }
 0x49e   : > { %v620_v28 = vpop.permute.xlu0 %619 }
 0x49f   : > { %v643_v29 = vadd.f32 %v642_v26, %v620_v28  ;;  %v950_v49 = vrot.slane %v949_v45, 1 }
 0x4a1   : > { %v648_v32 = vadd.f32 %v646_v59, %v643_v29  ;;  %v951_v57 = vadd.f32 %v950_v49, %v949_v45  ;;  %v1160_v27 = vpop.xlane.xlu1 %1159 }
 0x4a3   : > { %650 = vrot.lane.b32.xlu2 %v648_v32, %s1700_s23  ;;  %1623 = vrcp.f32 %v951_v57 }
 0x4a9   : > { %v1624_v58 = vpop.eup %1623 }
 0x4aa   : > { %v953_v15 = vmul.f32 %v1624_v58, %v1622_v39  ;;  %v1161_v39 = vrot.slane %v1160_v27, 4 }
 0x4ac   : > { %v954_v44 = vmul.f32 %v953_v15, %v1929_v9 }
 0x4ae   : > { %v955_v1 = vsel %vm446_vm3, %v954_v44, 0.0 }
 0x4af   : > { %v956_v5 = vrot.slane %v955_v1, 4 }
 0x4b1   : > { %v957_v13 = vadd.f32 %v956_v5, %v955_v1 }
 0x4b3   : > { %v958_v17 = vrot.slane %v957_v13, 2 }
 0x4b5   : > { %v959_v23 = vadd.f32 %v958_v17, %v957_v13 }
 0x4b7   : > { %v960_v32 = vrot.slane %v959_v23, 1 }
 0x4b9   : > { %v961_v38 = vadd.f32 %v960_v32, %v959_v23 }
 0x4bb   : > { %v983_v18 = vadd.f32 %v982_v36, %v961_v38 }
 0x4c9   : > { %v712_v19 = vpop.xlane.xlu0 %711 }
 0x4ca   : > { %v713_v41 = vrot.slane %v712_v19, 4 }
 0x4cc   : > { %v714_v43 = vmax.f32 %v712_v19, %v713_v41 }
 0x4ce   : > { %v715_v46 = vrot.slane %v714_v43, 2 }
 0x4d0   : > { %v716_v48 = vmax.f32 %v714_v43, %v715_v46  ;;  %v1162_v43 = vmax.f32 %v1160_v27, %v1161_v39 }
 0x4d2   : > { %v717_v53 = vrot.slane %v716_v48, 1 }
 0x4d4   : > { %v718_v55 = vmax.f32 %v716_v48, %v717_v53 }
 0x4d6   : > { %v719_v51 = vsub.f32 %v712_v19, %v718_v55 }
 0x4d8   : > { %v720_v12 = vmul.f32 1.442695, %v719_v51 }
 0x4da   : > { %1625 = vpow2.f32 %v720_v12 }
 0x4dc   : > { %v1068_v60 = vpop.permute.xlu2 %1067 }
 0x4dd   : > { %v1091_v24 = vadd.f32 %v1090_v8, %v1068_v60 }
 0x4e0   : > { %v1626_v21 = vpop.eup %1625 }
 0x4e1   : > { %v722_v7 = vrot.slane %v1626_v21, 4 }
 0x4e3   : > { %v723_v31 = vadd.f32 %v1626_v21, %v722_v7 }
 0x4e4   : > { %v1318_v52 = vpop.permute.xlu2 %1317 }
 0x4e5   : > { %v724_v61 = vrot.slane %v723_v31, 2 }
 0x4e7   : > { %v725_v62 = vadd.f32 %v724_v61, %v723_v31 }
 0x4e9   : > { %v726_v63 = vrot.slane %v725_v62, 1 }
 0x4eb   : > { %v727_v56 = vadd.f32 %v726_v63, %v725_v62 }
 0x4ec   : > { %v844_v2 = vpop.permute.xlu0 %843 }
 0x4ed   : > { %1627 = vrcp.f32 %v727_v56  ;;  %v867_v54 = vadd.f32 %v866_v0, %v844_v2 }
 0x4f3   : > { %v1628_v14 = vpop.eup %1627 }
 0x4f4   : > { %v729_v37 = vmul.f32 %v1628_v14, %v1626_v21  ;;  %v870_v16 = vpop.permute.xlu0 %869 }
 0x4f5   : > { %v872_v9 = vadd.f32 %v870_v16, %v867_v54 }
 0x4f6   : > { %v730_v10 = vmul.f32 %v729_v37, %v1925_v6 }
 0x4f7   : > { %874 = vrot.lane.b32.xlu0 %v872_v9, %s1700_s23 }
 0x4f8   : > { %v731_v47 = vsel %vm446_vm3, %v730_v10, 0.0 }
 0x4f9   : > { %v732_v22 = vrot.slane %v731_v47, 4 }
 0x4fb   : > { %v733_v25 = vadd.f32 %v732_v22, %v731_v47 }
 0x4fc   : > { %v1094_v26 = vpop.permute.xlu0 %1093 }
 0x4fd   : > { %v1292_v28 = vpop.permute.xlu1 %1291  ;;  %v1096_v29 = vadd.f32 %v1094_v26, %v1091_v24  ;;  %v651_v30 = vpop.permute.xlu2 %650  ;;  %v734_v59 = vrot.slane %v733_v25, 2 }
 0x4fe   : > { %v1315_v34 = vadd.f32 %v1314_v33, %v1292_v28  ;;  %653 = vst.msk [vmem:[%s1966_s17] sm:$0xff] %vm606_vm5, %v651_v30 }
 0x4ff   : > { %1210 = vrot.lane.b32.xlu0 %v1893_v42, %s1697_s14  ;;  %1098 = vrot.lane.b32.xlu2 %v1096_v29, %s1700_s23  ;;  %v735_v6 = vadd.f32 %v734_v59, %v733_v25  ;;  %v1163_v42 = vrot.slane %v1162_v43, 2  ;;  %s1514_s14 = sshll.u32 %s1754_s22, 5  ;;  %s1327_s22 = scalar_lea.sflag [#allocation3], %s248_s15 }
 0x500   : > { %v1320_v35 = vadd.f32 %v1318_v52, %v1315_v34  ;;  %s1338_s30 = scalar_lea.hbm %s2118_s5, %s1514_s14 }
 0x501   : > { %v736_v3 = vrot.slane %v735_v6, 1  ;;  %v1164_v46 = vmax.f32 %v1162_v43, %v1163_v42  ;;  %s1341_s7 = sshll.u32 %s1338_s30, 4  ;;  %s1342_s7 = int_to_ptr.hbm [resolvable:$true] %s1341_s7 }
 0x502   : > { %1322 = vrot.lane.b32.xlu1 %v1320_v35, %s1700_s23  ;;  %s1647_s8 = sshra.s32 %s1342_s7, 4  ;;  %s1648_s8 = int_to_ptr.hbm [resolvable:$true] %s1647_s8 }
 0x503   : > { %v737_v40 = vadd.f32 %v736_v3, %v735_v6  ;;  %v1165_v48 = vrot.slane %v1164_v46, 1  ;;  %s1649_s9 = scalar_lea.hbm %s1648_s8, 32  ;;  %p1654_p0 = scmp.lt.s32.totalorder %s1648_s8, %s2118_s5 }
 0x504   : > { %p1650_p11 = scmp.ne.s32.totalorder %s1648_s8, %s1649_s9  ;;  %p1655_p1 = scmp.lt.s32.totalorder %s1653_s12, %s1649_s9 }
 0x505   : > { %v987_v11 = vpop.permute.xlu1 %986  ;;  %v759_v19 = vadd.f32 %v758_v20, %v737_v40  ;;  %v1166_v49 = vmax.f32 %v1164_v46, %v1165_v48 }
 0x506   : > { %v989_v41 = vadd.f32 %v987_v11, %v983_v18  ;;  %p1651_p12 = pnand %p1650_p11, %p1771_p5  ;;  %p1656_p2 = por %p1655_p1, %p1654_p0 }
 0x507   : > { %v765_v45 = vadd.f32 %v763_v4, %v759_v19  ;;  %v1167_v53 = vsub.f32 %v1160_v27, %v1166_v49 }
 0x508   : > { %990 = vst.msk [vmem:[%s1966_s17 + $0x10] sm:$0xff] %vm446_vm3, %v989_v41  ;;  %p1652_p13 = pneg %p1651_p12 }
 0x509   : > { %766 = vst.msk [vmem:[%s1966_s17 + $0x8] sm:$0xff] %vm446_vm3, %v765_v45  ;;  %v1168_v55 = vmul.f32 1.442695, %v1167_v53 }
 0x50a   : > { %p1657_p3 = pnand %p1656_p2, %p1652_p13 }
 0x50b   : > { %1629 = vpow2.f32 %v1168_v55 }
 0x511   : > { %v1630_v57 = vpop.eup %1629 }
 0x512   : > { %v1170_v51 = vrot.slane %v1630_v57, 4 }
 0x514   : > { %v1171_v12 = vadd.f32 %v1630_v57, %v1170_v51 }
 0x516   : > { %v1172_v58 = vrot.slane %v1171_v12, 2 }
 0x518   : > { %v1173_v21 = vadd.f32 %v1172_v58, %v1171_v12 }
 0x51a   : > { %v1174_v7 = vrot.slane %v1173_v21, 1 }
 0x51c   : > { %v1175_v15 = vadd.f32 %v1174_v7, %v1173_v21 }
 0x51e   : > { %1631 = vrcp.f32 %v1175_v15 }
 0x524   : > { %v1632_v31 = vpop.eup %1631 }
 0x525   : > { %v1177_v61 = vmul.f32 %v1632_v31, %v1630_v57 }
 0x527   : > { %v1178_v44 = vmul.f32 %v1177_v61, %v1988_v50  ;;  %v1206_v50 = vpop.f32.mrf.mxu1 }
 0x529   : > { %v1179_v62 = vsel %vm446_vm3, %v1178_v44, 0.0 }
 0x52a   : > { %v1180_v0 = vrot.slane %v1179_v62, 4 }
 0x52c   : > { %v1181_v1 = vadd.f32 %v1180_v0, %v1179_v62 }
 0x52e   : > { %v1182_v56 = vrot.slane %v1181_v1, 2 }
 0x530   : > { %v1183_v60 = vadd.f32 %v1182_v56, %v1181_v1 }
 0x532   : > { %v1184_v2 = vrot.slane %v1183_v60, 1 }
 0x534   : > { %v1185_v5 = vadd.f32 %v1184_v2, %v1183_v60 }
 0x536   : > { %v1207_v8 = vadd.f32 %v1206_v50, %v1185_v5 }
 0x559   : > { %v1099_v63 = vpop.permute.xlu2 %1098 }
 0x55a   : > { %1101 = vst.msk [vmem:[%s1966_s17 + $0x10] sm:$0xff] %vm606_vm5, %v1099_v63 }
 0x569   : > { %v875_v4 = vpop.permute.xlu0 %874 }
 0x56a   : > { %877 = vst.msk [vmem:[%s1966_s17 + $0x8] sm:$0xff] %vm606_vm5, %v875_v4 }
 0x571   : > { %v1211_v13 = vpop.permute.xlu0 %1210 }
 0x572   : > { %v1213_v14 = vadd.f32 %v1211_v13, %v1207_v8 }
 0x574   : > { %1214 = vst.msk [vmem:[%s1966_s17 + $0x18] sm:$0xff] %vm446_vm3, %v1213_v14  ;;  %v1323_v54 = vpop.permute.xlu1 %1322 }
 0x575   : > { %1325 = vst.msk [vmem:[%s1966_s17 + $0x18] sm:$0xff] %vm606_vm5, %v1323_v54 }
 0x576   : > { %1660 = shalt.err (!%p1657_p3)
}
 0x577   : > { %s1701_s15 = smov 128   ;;  %s1702_s17 = smov 8  }
 0x578   : > { %1515 = dma.vmem_to_hbm [thread:$0]  (%p1771_p5), %s1340_s6, 512, %s1342_s7, %s1327_s22, %s1701_s15, %s1701_s15, %s1702_s17  }
 0x579 PF: > { %p1521_p4 = scmp.ge.s32.totalorder %s1695_s21, 2  ;;  %s1356_s23 = sand.u32 1, %s1683_s18  }
 0x57a   : > { %s1357_s14 = scalar_lea.sflag [#allocation3], %s1356_s23 }
 0x57b   : > { %p1518_p7 = pnand %p1521_p4, %p1775_p6 }
 0x57d   : > { %p1519_p8 = pneg %p1518_p7 }
 0x57f   : > { %1678 = dma.done.wait (%p1519_p8), %s1357_s14, 512  }
 0x580   : > { %1680 = vsyncadd (%p1519_p8), %s1357_s14, 4294966784  ;;  %p15_p9 = scmp.ge.s32.totalorder %s1758_s24, 4   ;;  %s2121_s18 = smov %s1687_s19 }
 0x581   : > { %s2122_s19 = smov %s1691_s20  ;;  %s2123_s20 = smov %s1769_s27 }
 0x582   : > { %s2124_s21 = smov %s1758_s24  ;;  %17 = sbr.rel (!%p15_p9) target bundleno = 3 (0x3), region = 81 }
 0x587   :  { %1363 = vsyncpa [#allocation3], 1 }
 0x588   :  { %1365 = vsyncpa [#allocation3 + $0x1], 1 }

</bundles_post_ra>
